<compile_context>
chip_gen: v7x
topology: tpu7x:2x2x1
jax: 0.10.0
libtpu: 0.0.40
codegen_flags: <defaults>
</compile_context>

<pallas_src>
import jax
import jax.numpy as jnp
from jax.experimental import pallas as pl
from jax.experimental.pallas import tpu as pltpu

HIDDEN1 = 1000
HIDDEN2 = 400
H1_PAD = 1024   # 1000 -> next multiple of 128
H2_PAD = 512    # 400  -> next multiple of 128


def _round_up(n, m):
    return (n + m - 1) // m * m


def _encoder_kernel(x_ref, w1_ref, b1_ref, w2_ref, b2_ref, wh_ref, bh_ref,
                    out_ref, h1_acc):
    """Grid = (batch tiles ["parallel"], K tiles over input_dim ["arbitrary"])."""
    k = pl.program_id(1)

    @pl.when(k == 0)
    def _():
        h1_acc[...] = jnp.zeros_like(h1_acc)

    # Layer-1 partial matmul: (tb, tk)bf16 @ (tk, 1024)bf16 -> f32 accumulator.
    h1_acc[...] += jnp.dot(x_ref[...], w1_ref[...],
                           preferred_element_type=jnp.float32)

    @pl.when(k == pl.num_programs(1) - 1)
    def _():
        # Layer 1 bias + ReLU in f32 (VPU), cast to bf16 for the next MXU pass.
        h1 = jnp.maximum(h1_acc[...] + b1_ref[...], 0.0).astype(jnp.bfloat16)
        # Layer 2: (tb, 1024) @ (1024, 512) + bias + ReLU.
        h2 = jnp.dot(h1, w2_ref[...], preferred_element_type=jnp.float32)
        h2 = jnp.maximum(h2 + b2_ref[...], 0.0).astype(jnp.bfloat16)
        # Fused heads: one lane-dense matmul with [W_mu | W_lcov] (zero-padded).
        out = jnp.dot(h2, wh_ref[...], preferred_element_type=jnp.float32)
        out_ref[...] = (out + bh_ref[...]).astype(out_ref.dtype)


def _pad2(a, rows, cols, dtype):
    """Zero-pad a 2-D array to (rows, cols) and cast."""
    out = jnp.zeros((rows, cols), dtype)
    return out.at[:a.shape[0], :a.shape[1]].set(a.astype(dtype))


def _pick_tb(batch):
    """Batch tile <= 256, multiple of 8, dividing batch, with >= 2 grid steps
    when the batch allows it (DMA pipelining / v7x megacore)."""
    if batch <= 256:
        half = batch // 2
        if batch >= 16 and batch % 2 == 0 and half % 8 == 0:
            return half
        return batch
    for cand in (256, 128, 64, 32, 16, 8):
        if batch % cand == 0:
            return cand
    return batch


def encoder_oasis_forward(x, params, *, tb=None, tk=None):
    """x: (B, input_dim) float32. Returns (embedding, log_covariance), both f32."""
    B, input_dim = x.shape
    latent_dim = params["wmu"].shape[1]

    d_pad = _round_up(input_dim, 128)
    head_pad = _round_up(2 * latent_dim, 128)   # lane-dense fused head output

    if tb is None:
        tb = _pick_tb(B)
    if tk is None:
        # Stream W1 in K chunks only when it is big; otherwise one K step.
        tk = d_pad if d_pad <= 2048 else 512
    assert B % tb == 0, "batch must be divisible by the batch tile"
    assert tb == B or tb % 8 == 0, "(8,128) rule: batch tile must be a multiple of 8"
    assert d_pad % tk == 0 and tk % 128 == 0

    f32, bf16 = jnp.float32, jnp.bfloat16

    # Zero-pad to clean MXU shapes; bf16 weights/x (f32 accumulation requested on
    # every dot). Biases stay f32. (In production, pre-pack these once.)
    xp = _pad2(x, B, d_pad, bf16)
    w1 = _pad2(params["w1"], d_pad, H1_PAD, bf16)
    b1 = _pad2(params["b1"], 1, H1_PAD, f32)
    w2 = _pad2(params["w2"], H1_PAD, H2_PAD, bf16)
    b2 = _pad2(params["b2"], 1, H2_PAD, f32)
    wh = _pad2(jnp.concatenate([params["wmu"], params["wlc"]], axis=1),
               H2_PAD, head_pad, bf16)
    bh = _pad2(jnp.concatenate([params["bmu"], params["blc"]], axis=1),
               1, head_pad, f32)

    grid = (B // tb, d_pad // tk)
    const = lambda shape: pl.BlockSpec(shape, lambda i, k: (0, 0))

    head = pl.pallas_call(
        _encoder_kernel,
        out_shape=jax.ShapeDtypeStruct((B, head_pad), f32),
        grid_spec=pltpu.PrefetchScalarGridSpec(
            num_scalar_prefetch=0,
            grid=grid,
            in_specs=[
                pl.BlockSpec((tb, tk), lambda i, k: (i, k)),       # x tile
                pl.BlockSpec((tk, H1_PAD), lambda i, k: (k, 0)),   # W1 K-slice
                const((1, H1_PAD)),                                # b1
                const((H1_PAD, H2_PAD)),                           # W2
                const((1, H2_PAD)),                                # b2
                const((H2_PAD, head_pad)),                         # [W_mu | W_lcov]
                const((1, head_pad)),                              # [b_mu | b_lcov]
            ],
            out_specs=pl.BlockSpec((tb, head_pad), lambda i, k: (i, 0)),
            scratch_shapes=[pltpu.VMEM((tb, H1_PAD), f32)],        # layer-1 accumulator
        ),
        compiler_params=pltpu.CompilerParams(
            dimension_semantics=("parallel", "arbitrary"),
        ),
    )(xp, w1, b1, w2, b2, wh, bh)

    mu = head[:, :latent_dim]
    lcov = head[:, latent_dim:2 * latent_dim]
    return mu, lcov


def init_params(key, input_dim, latent_dim):
    """Deterministic synthetic init (PyTorch-Linear-like uniform scaling)."""
    ks = jax.random.split(key, 8)

    def lin(kw, kb, fan_in, fan_out):
        bound = 1.0 / jnp.sqrt(fan_in)
        w = jax.random.uniform(kw, (fan_in, fan_out), jnp.float32, -bound, bound)
        b = jax.random.uniform(kb, (1, fan_out), jnp.float32, -bound, bound)
        return w, b

    w1, b1 = lin(ks[0], ks[1], input_dim, HIDDEN1)
    w2, b2 = lin(ks[2], ks[3], HIDDEN1, HIDDEN2)
    wmu, bmu = lin(ks[4], ks[5], HIDDEN2, latent_dim)
    wlc, blc = lin(ks[6], ks[7], HIDDEN2, latent_dim)
    return dict(w1=w1, b1=b1, w2=w2, b2=b2,
                wmu=wmu, bmu=bmu, wlc=wlc, blc=blc)


def reference_forward(x, p):
    """Pure-JAX reference using the same bf16-weight / f32-accumulate recipe.
    (Differs from pure-f32 PyTorch only by bf16 rounding of inputs/activations.)"""
    bf = lambda a: a.astype(jnp.bfloat16).astype(jnp.float32)
    h = jnp.maximum(bf(x) @ bf(p["w1"]) + p["b1"], 0.0)
    h = jnp.maximum(bf(h) @ bf(p["w2"]) + p["b2"], 0.0)
    h = bf(h)
    return h @ bf(p["wmu"]) + p["bmu"], h @ bf(p["wlc"]) + p["blc"]


if __name__ == "__main__":
    key = jax.random.PRNGKey(0)
    kx, kp = jax.random.split(key)

    batch, input_dim, latent_dim = 64, 300, 16
    x = jax.random.normal(kx, (batch, input_dim), jnp.float32)
    params = init_params(kp, input_dim, latent_dim)

    # tk=128 exercises the K-tiled layer-1 accumulation path (300 -> 384 padded
    # -> 3 K steps); tb defaults to 32 -> 2 pipelined "parallel" batch tiles.
    mu, lcov = encoder_oasis_forward(x, params, tk=128)
    jax.block_until_ready((mu, lcov))

    mu_ref, lcov_ref = reference_forward(x, params)
    assert mu.shape == (batch, latent_dim) and lcov.shape == (batch, latent_dim)
    assert jnp.allclose(mu, mu_ref, atol=1e-2, rtol=1e-2), \
        float(jnp.max(jnp.abs(mu - mu_ref)))
    assert jnp.allclose(lcov, lcov_ref, atol=1e-2, rtol=1e-2), \
        float(jnp.max(jnp.abs(lcov - lcov_ref)))

    print("KERNEL_OK")
</pallas_src>

<mosaic_0001>
module attributes {stable_mosaic.version = 11 : i64} {
  func.func @_encoder_kernel(%arg0: i32, %arg1: i32, %arg2: memref<32x128xbf16, #tpu.memory_space<vmem>>, %arg3: memref<128x1024xbf16, #tpu.memory_space<vmem>>, %arg4: memref<1x1024xf32, #tpu.memory_space<vmem>>, %arg5: memref<1024x512xbf16, #tpu.memory_space<vmem>>, %arg6: memref<1x512xf32, #tpu.memory_space<vmem>>, %arg7: memref<512x128xbf16, #tpu.memory_space<vmem>>, %arg8: memref<1x128xf32, #tpu.memory_space<vmem>>, %arg9: memref<32x128xf32, #tpu.memory_space<vmem>>, %arg10: memref<32x1024xf32, #tpu.memory_space<vmem>>) attributes {dimension_semantics = [#tpu.dimension_semantics<parallel>, #tpu.dimension_semantics<arbitrary>], iteration_bounds = array<i64: 2, 3>, scalar_prefetch = 0 : i64, scratch_operands = 1 : i64, tpu.core_type = #tpu.core_type<tc>, window_params = [{transform_indices = @transform_0, window_bounds = array<i64: 32, 128>}, {transform_indices = @transform_1, window_bounds = array<i64: 128, 1024>}, {pipeline_mode = #tpu.pipeline_mode<synchronous>, transform_indices = @transform_2, window_bounds = array<i64: 1, 1024>}, {pipeline_mode = #tpu.pipeline_mode<synchronous>, transform_indices = @transform_3, window_bounds = array<i64: 1024, 512>}, {pipeline_mode = #tpu.pipeline_mode<synchronous>, transform_indices = @transform_4, window_bounds = array<i64: 1, 512>}, {pipeline_mode = #tpu.pipeline_mode<synchronous>, transform_indices = @transform_5, window_bounds = array<i64: 512, 128>}, {pipeline_mode = #tpu.pipeline_mode<synchronous>, transform_indices = @transform_6, window_bounds = array<i64: 1, 128>}, {transform_indices = @transform_7, window_bounds = array<i64: 32, 128>}]} {
    %c0_i32 = arith.constant 0 : i32
    %0 = arith.cmpi eq, %arg1, %c0_i32 : i32
    %1 = arith.extui %0 : i1 to i32
    %c0_i32_0 = arith.constant 0 : i32
    %2 = arith.cmpi ne, %1, %c0_i32_0 : i32
    scf.if %2 {
      %cst_9 = arith.constant 0.000000e+00 : f32
      %12 = vector.broadcast %cst_9 : f32 to vector<32x1024xf32>
      %c0_10 = arith.constant 0 : index
      %c0_11 = arith.constant 0 : index
      %13 = vector.load %arg10[%c0_10, %c0_11] : memref<32x1024xf32, #tpu.memory_space<vmem>>, vector<32x1024xf32>
      tpu.vector_store %arg10[%c0_10, %c0_11], %12 {strides = array<i32>} : memref<32x1024xf32, #tpu.memory_space<vmem>>, vector<32x1024xf32>,
    } else {
    }
    %c0 = arith.constant 0 : index
    %c0_1 = arith.constant 0 : index
    %3 = vector.load %arg10[%c0, %c0_1] : memref<32x1024xf32, #tpu.memory_space<vmem>>, vector<32x1024xf32>
    %c0_2 = arith.constant 0 : index
    %c0_3 = arith.constant 0 : index
    %4 = vector.load %arg2[%c0_2, %c0_3] : memref<32x128xbf16, #tpu.memory_space<vmem>>, vector<32x128xbf16>
    %c0_4 = arith.constant 0 : index
    %c0_5 = arith.constant 0 : index
    %5 = vector.load %arg3[%c0_4, %c0_5] : memref<128x1024xbf16, #tpu.memory_space<vmem>>, vector<128x1024xbf16>
    %cst = arith.constant dense<0.000000e+00> : vector<32x1024xf32>
    %6 = tpu.matmul %4, %5, %cst {dimension_numbers = #tpu.dot_dimension_numbers<[1], [0], [0], [1], [0, 0, 1, 1], [], []>} : vector<32x128xbf16>, vector<128x1024xbf16>, vector<32x1024xf32> -> vector<32x1024xf32>
    %7 = arith.addf %3, %6 : vector<32x1024xf32>
    %c0_6 = arith.constant 0 : index
    %c0_7 = arith.constant 0 : index
    %8 = vector.load %arg10[%c0_6, %c0_7] : memref<32x1024xf32, #tpu.memory_space<vmem>>, vector<32x1024xf32>
    tpu.vector_store %arg10[%c0_6, %c0_7], %7 {strides = array<i32>} : memref<32x1024xf32, #tpu.memory_space<vmem>>, vector<32x1024xf32>,
    %c2_i32 = arith.constant 2 : i32
    %9 = arith.cmpi eq, %arg1, %c2_i32 : i32
    %10 = arith.extui %9 : i1 to i32
    %c0_i32_8 = arith.constant 0 : i32
    %11 = arith.cmpi ne, %10, %c0_i32_8 : i32
    scf.if %11 {
      %c0_9 = arith.constant 0 : index
      %c0_10 = arith.constant 0 : index
      %12 = vector.load %arg10[%c0_9, %c0_10] : memref<32x1024xf32, #tpu.memory_space<vmem>>, vector<32x1024xf32>
      %c0_11 = arith.constant 0 : index
      %c0_12 = arith.constant 0 : index
      %13 = vector.load %arg4[%c0_11, %c0_12] : memref<1x1024xf32, #tpu.memory_space<vmem>>, vector<1x1024xf32>
      %14 = vector.broadcast %13 : vector<1x1024xf32> to vector<32x1024xf32>
      %15 = arith.addf %12, %14 : vector<32x1024xf32>
      %cst_13 = arith.constant 0.000000e+00 : f32
      %16 = vector.broadcast %cst_13 : f32 to vector<32x1024xf32>
      %17 = arith.maximumf %15, %16 : vector<32x1024xf32>
      %18 = arith.truncf %17 : vector<32x1024xf32> to vector<32x1024xbf16>
      %c0_14 = arith.constant 0 : index
      %c0_15 = arith.constant 0 : index
      %19 = vector.load %arg5[%c0_14, %c0_15] : memref<1024x512xbf16, #tpu.memory_space<vmem>>, vector<1024x512xbf16>
      %cst_16 = arith.constant dense<0.000000e+00> : vector<32x512xf32>
      %20 = tpu.matmul %18, %19, %cst_16 {dimension_numbers = #tpu.dot_dimension_numbers<[1], [0], [0], [1], [0, 0, 1, 1], [], []>} : vector<32x1024xbf16>, vector<1024x512xbf16>, vector<32x512xf32> -> vector<32x512xf32>
      %c0_17 = arith.constant 0 : index
      %c0_18 = arith.constant 0 : index
      %21 = vector.load %arg6[%c0_17, %c0_18] : memref<1x512xf32, #tpu.memory_space<vmem>>, vector<1x512xf32>
      %22 = vector.broadcast %21 : vector<1x512xf32> to vector<32x512xf32>
      %23 = arith.addf %20, %22 : vector<32x512xf32>
      %cst_19 = arith.constant 0.000000e+00 : f32
      %24 = vector.broadcast %cst_19 : f32 to vector<32x512xf32>
      %25 = arith.maximumf %23, %24 : vector<32x512xf32>
      %26 = arith.truncf %25 : vector<32x512xf32> to vector<32x512xbf16>
      %c0_20 = arith.constant 0 : index
      %c0_21 = arith.constant 0 : index
      %27 = vector.load %arg7[%c0_20, %c0_21] : memref<512x128xbf16, #tpu.memory_space<vmem>>, vector<512x128xbf16>
      %cst_22 = arith.constant dense<0.000000e+00> : vector<32x128xf32>
      %28 = tpu.matmul %26, %27, %cst_22 {dimension_numbers = #tpu.dot_dimension_numbers<[1], [0], [0], [1], [0, 0, 1, 1], [], []>} : vector<32x512xbf16>, vector<512x128xbf16>, vector<32x128xf32> -> vector<32x128xf32>
      %c0_23 = arith.constant 0 : index
      %c0_24 = arith.constant 0 : index
      %29 = vector.load %arg8[%c0_23, %c0_24] : memref<1x128xf32, #tpu.memory_space<vmem>>, vector<1x128xf32>
      %30 = vector.broadcast %29 : vector<1x128xf32> to vector<32x128xf32>
      %31 = arith.addf %28, %30 : vector<32x128xf32>
      %c0_25 = arith.constant 0 : index
      %c0_26 = arith.constant 0 : index
      %32 = vector.load %arg9[%c0_25, %c0_26] : memref<32x128xf32, #tpu.memory_space<vmem>>, vector<32x128xf32>
      tpu.vector_store %arg9[%c0_25, %c0_26], %31 {strides = array<i32>} : memref<32x128xf32, #tpu.memory_space<vmem>>, vector<32x128xf32>,
    } else {
    }
    return
  }
  func.func @transform_0(%arg0: i32, %arg1: i32) -> (i32, i32) {
    %c0_i32 = arith.constant 0 : i32
    return %arg0, %arg1 : i32, i32
  }
  func.func @transform_1(%arg0: i32, %arg1: i32) -> (i32, i32) {
    %c0_i32 = arith.constant 0 : i32
    %c0_i32_0 = arith.constant 0 : i32
    return %arg1, %c0_i32 : i32, i32
  }
  func.func @transform_2(%arg0: i32, %arg1: i32) -> (i32, i32) {
    %c0_i32 = arith.constant 0 : i32
    %c0_i32_0 = arith.constant 0 : i32
    %c0_i32_1 = arith.constant 0 : i32
    return %c0_i32, %c0_i32_0 : i32, i32
  }
  func.func @transform_3(%arg0: i32, %arg1: i32) -> (i32, i32) {
    %c0_i32 = arith.constant 0 : i32
    %c0_i32_0 = arith.constant 0 : i32
    %c0_i32_1 = arith.constant 0 : i32
    return %c0_i32, %c0_i32_0 : i32, i32
  }
  func.func @transform_4(%arg0: i32, %arg1: i32) -> (i32, i32) {
    %c0_i32 = arith.constant 0 : i32
    %c0_i32_0 = arith.constant 0 : i32
    %c0_i32_1 = arith.constant 0 : i32
    return %c0_i32, %c0_i32_0 : i32, i32
  }
  func.func @transform_5(%arg0: i32, %arg1: i32) -> (i32, i32) {
    %c0_i32 = arith.constant 0 : i32
    %c0_i32_0 = arith.constant 0 : i32
    %c0_i32_1 = arith.constant 0 : i32
    return %c0_i32, %c0_i32_0 : i32, i32
  }
  func.func @transform_6(%arg0: i32, %arg1: i32) -> (i32, i32) {
    %c0_i32 = arith.constant 0 : i32
    %c0_i32_0 = arith.constant 0 : i32
    %c0_i32_1 = arith.constant 0 : i32
    return %c0_i32, %c0_i32_0 : i32, i32
  }
  func.func @transform_7(%arg0: i32, %arg1: i32) -> (i32, i32) {
    %c0_i32 = arith.constant 0 : i32
    %c0_i32_0 = arith.constant 0 : i32
    return %arg0, %c0_i32 : i32, i32
  }
}

</mosaic_0001>

<bundles_post_ra>
// kernel: tpu_custom_call.1
= control target key start
LH: loop header
LB: loop body
LE: loop exit
PB: predicated region body
PF: predicated region fallthrough
CT: control target
= control target key end

     0   :  { %s5894_s0 = inlined_call_operand.hbm [shape: bf16[64,384], index: 0, kind: input, shape index: {}]   ;;  %s5895_s1 = inlined_call_operand.hbm [shape: bf16[384,1024], index: 1, kind: input, shape index: {}]   ;;  %s5896_s2 = inlined_call_operand.hbm [shape: f32[1,1024], index: 2, kind: input, shape index: {}]   ;;  %s5897_s3 = inlined_call_operand.hbm [shape: bf16[1024,512], index: 3, kind: input, shape index: {}]   ;;  %s5898_s4 = inlined_call_operand.vmem [shape: f32[1,512], index: 4, kind: input, shape index: {}]   ;;  %s5899_s5 = inlined_call_operand.hbm [shape: bf16[512,128], index: 5, kind: input, shape index: {}]   ;;  %s5900_s6 = inlined_call_operand.vmem [shape: f32[1,128], index: 6, kind: input, shape index: {}]   ;;  %s5901_s7 = inlined_call_operand.hbm [shape: f32[64,128], index: 7, kind: output, shape index: {}]  }
   0x1   :  { %5923 = sst [smem:[#allocation27_spill]] %s5896_s2 }
   0x2   :  { %5924 = sst [smem:[#allocation28_spill]] %s5897_s3 }
   0x3   :  { %5925 = sst [smem:[#allocation29_spill]] %s5898_s4 }
   0x4   :  { %5926 = sst [smem:[#allocation30_spill]] %s5899_s5 }
   0x5   :  { %5927 = sst [smem:[#allocation31_spill]] %s5900_s6 }
   0x6   :  { %5928 = sst [smem:[#allocation32_spill]] %s5901_s7 }
   0x7   :  { %12 = vsyncpa [#allocation4], 0 }
   0x8   :  { %14 = vsyncpa [#allocation4 + $0x1], 0 }
   0x9   :  { %15 = vsyncpa [#allocation7], 0 }
   0xa   :  { %17 = vsyncpa [#allocation7 + $0x1], 0 }
   0xb   :  { %18 = vsyncpa [#allocation10], 0 }
   0xc   :  { %19 = vsyncpa [#allocation5], 0 }
   0xd   :  { %21 = vsyncpa [#allocation5 + $0x1], 0  ;;  %s5284_s24 = smov 0   ;;  %s5286_s25 = smov 0  }
   0xe   :  { %s5288_s26 = smov 0   ;;  %s5290_s27 = smov 0  }
   0xf   :  { %s5292_s28 = smov 0   ;;  %s5294_s29 = smov 0  }
  0x10   :  { %s5296_s30 = smov 0   ;;  %s5298_s8 = smov 0  }
  0x11   :  { %s5300_s9 = smov 0   ;;  %s5302_s10 = smov 0  }
  0x12   :  { %s5304_s11 = smov 0   ;;  %s5306_s12 = smov 0  }
  0x13   :  { %s5308_s13 = smov 0   ;;  %s5310_s14 = smov 0  }
  0x14 LB: > { %5929 = sst [smem:[#allocation18_spill]] %s5173_s24  ;;  %s5351_s15 = sadd.s32 4294967295, %s5225_s14   ;;  %s5225_s14 = sphi %s5310_s14, %s27_s14   ;;  %s5221_s13 = sphi %s5308_s13, %s5993_s13   ;;  %s5217_s12 = sphi %s5306_s12, %s5992_s12   ;;  %s5213_s11 = sphi %s5304_s11, %s5991_s11   ;;  %s5209_s10 = sphi %s5302_s10, %s5990_s10   ;;  %s5205_s9 = sphi %s5300_s9, %s5989_s9   ;;  %s5201_s8 = sphi %s5298_s8, %s5988_s8   ;;  %s5197_s30 = sphi %s5296_s30, %s5987_s30   ;;  %s5193_s29 = sphi %s5294_s29, %s5986_s29   ;;  %s5189_s28 = sphi %s5292_s28, %s5985_s28   ;;  %s5185_s27 = sphi %s5290_s27, %s5984_s27   ;;  %s5181_s26 = sphi %s5288_s26, %s5983_s26   ;;  %s5177_s25 = sphi %s5286_s25, %s5982_s25   ;;  %s5173_s24 = sphi %s5284_s24, %s5979_s24  }
  0x15   : > { %5930 = sst [smem:[#allocation19_spill]] %s5177_s25  ;;  %s3824_s16 = sadd.s32 4294967294, %s5225_s14  }
  0x16   : > { %5931 = sst [smem:[#allocation20_spill]] %s5209_s10  ;;  %p61_p0 = scmp.ne.s32.totalorder %s5201_s8, %s5197_s30 }
  0x17   : > { %5932 = sst [smem:[#allocation21_spill]] %s5213_s11  ;;  %p5907_p1 = scmp.eq.s32.totalorder %s5351_s15, 0 }
  0x18   : > { %5933 = sst [smem:[#allocation22_spill]] %s5351_s15  ;;  %p87_p2 = scmp.ne.s32.totalorder %s5189_s28, %s5185_s27 }
  0x19   : > { %p5360_p3 = por %p5907_p1, %p61_p0  ;;  %p215_p4 = scmp.ne.s32.totalorder %s5181_s26, %s5177_s25 }
  0x1a   : > { %p5368_p5 = por %p87_p2, %p5907_p1  ;;  %p216_p6 = scmp.eq.s32.totalorder %s5351_s15, 5 }
  0x1b   : > { %s5934_s18 = scalar_select %p5360_p3, 1, 0 }
  0x1c   : > { %s5935_s19 = scalar_select %p5368_p5, 1, 0 }
  0x1d   : > { %p221_p7 = scmp.ne.s32.totalorder %s5177_s25, %s5173_s24  ;;  %p222_p8 = scmp.eq.s32.totalorder %s3824_s16, 5 }
  0x1e   : > { %5936 = sst [smem:[#allocation23_spill]] %s5935_s19  ;;  %p5375_p9 = por %p216_p6, %p215_p4 }
  0x1f   : > { %p3825_p10 = scmp.ge.s32.totalorder %s5225_s14, 1  ;;  %p5380_p11 = por %p222_p8, %p221_p7 }
  0x20   : > { %s5937_s20 = scalar_select %p5375_p9, 1, 0 }
  0x21   : > { %s5939_s21 = scalar_select %p5380_p11, 1, 0 }
  0x22   : > { %5938 = sst [smem:[#allocation24_spill]] %s5937_s20  ;;  %p229_p12 = scmp.lt.s32.totalorder %s5225_s14, 7 }
  0x23   : > { %5940 = sst [smem:[#allocation25_spill]] %s5939_s21  ;;  %s5227_s23 = smov [#allocation8]  }
  0x24   : > { %p5385_p13 = pnand %p3825_p10, %p229_p12  ;;  %s242_s27 = sshll.u32 %s5227_s23, 4  ;;  %s243_s27 = int_to_ptr.vmem [resolvable:$true] %s242_s27 }
  0x25   : > { %s5228_s30 = smov [#allocation9]   ;;  %s5229_s21 = smov [#allocation11]  }
  0x26   : > { %s5941_s22 = scalar_select %p5385_p13, 1, 0 }
  0x27   : > { %p4349_p0 = pneg %p5385_p13  ;;  %s252_s16 = sshll.u32 %s5228_s30, 4  ;;  %s5397_s16 = int_to_ptr.vmem [resolvable:$true] %s252_s16 }
  0x28   : > { %s5399_s24 = sshll.u32 %s5229_s21, 4  ;;  %s5943_s2 = sld [smem:[#allocation27_spill]]  ;;  %s269_s24 = int_to_ptr.vmem [resolvable:$true] %s5399_s24 }
  0x29   : > { %p5393_p2 = pnand %p4349_p0, %p5907_p1 }
  0x2b   : > { %p5409_p6 = pneg %p5393_p2 }
  0x2e   : > { %s4923_s23 = scalar_lea.hbm %s5943_s2, 128 }
  0x2f   : > { %p4924_p4 = scmp.ne.s32.totalorder %s5943_s2, %s4923_s23  ;;  %p4930_p10 = scmp.lt.u32.totalorder %s4923_s23, %s5943_s2 }
  0x31   : > { %p4926_p7 = pnand %p5409_p6, %p4924_p4 }
  0x33   : > { %p4927_p8 = pneg %p4926_p7 }
  0x35   : > { %p4932_p12 = pnand %p4930_p10, %p4927_p8 }
  0x37   : > { %4935 = shalt.err (!%p4932_p12)
}
  0x38   : > { %s4936_s7 = scalar_lea.vmem %s243_s27, 128  ;;  %p4944_p9 = scmp.lt.s32.totalorder %s243_s27, %s243_s27 }
  0x39   : > { %p4937_p0 = scmp.ne.s32.totalorder %s243_s27, %s4936_s7  ;;  %p4945_p5 = scmp.lt.s32.totalorder %s4936_s7, %s4936_s7 }
  0x3b   : > { %p4939_p1 = pnand %p4937_p0, %p5409_p6  ;;  %p4946_p3 = por %p4945_p5, %p4944_p9 }
  0x3d   : > { %p4940_p11 = pneg %p4939_p1 }
  0x3f   : > { %p4947_p13 = pnand %p4946_p3, %p4940_p11 }
  0x41   : > { %4950 = shalt.err (!%p4947_p13)
}
  0x42   : > { %4352 = dma.hbm_to_vmem [thread:$0]  (!%p5393_p2), %s5943_s2, 128, %s243_s27, [#allocation7]  }
  0x43   : > { %s5945_s3 = sld [smem:[#allocation28_spill]] }
  0x49   : > { %s4951_s23 = scalar_lea.hbm %s5945_s3, 32768 }
  0x4a   : > { %p4952_p1 = scmp.ne.s32.totalorder %s5945_s3, %s4951_s23  ;;  %p4958_p3 = scmp.lt.u32.totalorder %s4951_s23, %s5945_s3 }
  0x4c   : > { %p4954_p4 = pnand %p4952_p1, %p5409_p6 }
  0x4e   : > { %p4955_p5 = pneg %p4954_p4 }
  0x50   : > { %p4960_p9 = pnand %p4958_p3, %p4955_p5 }
  0x52   : > { %4963 = shalt.err (!%p4960_p9)
}
  0x53   : > { %s4964_s27 = scalar_lea.vmem %s5397_s16, 32768  ;;  %p4972_p8 = scmp.lt.s32.totalorder %s5397_s16, %s5397_s16 }
  0x54   : > { %p4965_p11 = scmp.ne.s32.totalorder %s5397_s16, %s4964_s27  ;;  %p4973_p10 = scmp.lt.s32.totalorder %s4964_s27, %s4964_s27 }
  0x56   : > { %p4967_p13 = pnand %p4965_p11, %p5409_p6  ;;  %p4974_p12 = por %p4973_p10, %p4972_p8 }
  0x58   : > { %p4968_p7 = pneg %p4967_p13 }
  0x5a   : > { %p4975_p0 = pnand %p4974_p12, %p4968_p7 }
  0x5c   : > { %4978 = shalt.err (!%p4975_p0)
}
  0x5d   : > { %s5230_s10 = smov 256   ;;  %s5231_s25 = smov 16  }
  0x5e   : > { %4355 = dma.hbm_to_vmem [thread:$0]  (!%p5393_p2), %s5945_s3, 32768, %s5397_s16, [#allocation10], %s5230_s10, %s5230_s10, %s5231_s25  }
  0x5f   : > { %s5946_s5 = sld [smem:[#allocation30_spill]] }
  0x65   : > { %s4979_s23 = scalar_lea.hbm %s5946_s5, 4096 }
  0x66   : > { %p4980_p1 = scmp.ne.s32.totalorder %s5946_s5, %s4979_s23  ;;  %p4986_p3 = scmp.lt.u32.totalorder %s4979_s23, %s5946_s5 }
  0x68   : > { %p4982_p4 = pnand %p4980_p1, %p5409_p6 }
  0x6a   : > { %p4983_p5 = pneg %p4982_p4 }
  0x6c   : > { %p4988_p9 = pnand %p4986_p3, %p4983_p5 }
  0x6e   : > { %4991 = shalt.err (!%p4988_p9)
}
  0x6f   : > { %s4992_s6 = scalar_lea.vmem %s269_s24, 4096  ;;  %p5000_p8 = scmp.lt.s32.totalorder %s269_s24, %s269_s24 }
  0x70   : > { %p4993_p11 = scmp.ne.s32.totalorder %s269_s24, %s4992_s6  ;;  %p5001_p10 = scmp.lt.s32.totalorder %s4992_s6, %s4992_s6 }
  0x72   : > { %p4995_p13 = pnand %p4993_p11, %p5409_p6  ;;  %p5002_p12 = por %p5001_p10, %p5000_p8 }
  0x74   : > { %p4996_p7 = pneg %p4995_p13 }
  0x76   : > { %p5003_p0 = pnand %p5002_p12, %p4996_p7 }
  0x78   : > { %5006 = shalt.err (!%p5003_p0)
}
  0x79   : > { %s5914_s16 = smov 64   ;;  %s5915_s2 = smov 4  }
  0x7a   : > { %4358 = dma.hbm_to_vmem [thread:$0]  (!%p5393_p2), %s5946_s5, 4096, %s269_s24, [#allocation10], %s5914_s16, %s5914_s16, %s5915_s2  }
  0x7b   : > { %s36_s25 = sadd.s32 1, %s5217_s12  ;;  %s39_s11 = sadd.s32 1, %s5221_s13 }
  0x7c   : > { %p37_p6 = scmp.ge.s32.totalorder %s36_s25, 3  ;;  %s48_s4 = sadd.s32 1, %s5205_s9 }
  0x7d   : > { %p55_p1 = scmp.ne.s32.totalorder %s5205_s9, %s5201_s8  ;;  %p5922_p2 = scmp.eq.s32.totalorder %s5225_s14, 0 }
  0x7e   : > { %s5995_s25 = smov (%p37_p6, %s36_s25), 0  ;;  %s5997_s11 = smov (!%p37_p6, %s39_s11), %s5221_s13 }
  0x7f   : > { %5947 = sst [smem:[#allocation26_spill]] %s5995_s25  ;;  %s5480_s17 = ssub.s32 %s5217_s12, %s5995_s25 }
  0x80   : > { %p41_p4 = scmp.ge.s32.totalorder %s5997_s11, 2  ;;  %p72_p5 = scmp.eq.s32.totalorder %s5480_s17, 0 }
  0x81   : > { %p5486_p3 = por %p5922_p2, %p55_p1  ;;  %p5921_p9 = scmp.lt.s32.totalorder %s5225_s14, 6 }
  0x82   : > { %s5999_s11 = smov (%p41_p4, %s5997_s11), 0  ;;  %s285_s20 = sand.u32 1, %s5205_s9  }
  0x83   : > { %s4330_s23 = smul.u32 12, %s5221_s13  ;;  %s43_s21 = ssub.s32 %s5221_s13, %s5999_s11 }
  0x84   : > { %s45_s7 = sor.u32 %s5480_s17, %s43_s21  ;;  %p203_p11 = scmp.eq.s32.totalorder %s43_s21, 0 }
  0x85   : > { %p46_p13 = scmp.eq.s32.totalorder %s45_s7, 0  ;;  %s3830_s27 = sshll.u32 %s285_s20, 4 }
  0x86   : > { %s5949_s6 = sadd.s32 1, %s5181_s26  ;;  %s295_s16 = sadd.s32 %s5217_s12, %s4330_s23 }
  0x87   : > { %s5501_s30 = scalar_select %p203_p11, %s5181_s26, %s5949_s6  }
  0x88   : > { %s5504_s10 = scalar_select %p46_p13, %s5205_s9, %s48_s4  }
  0x89   : > { %s3833_s2 = sshll.u32 %s295_s16, 6  ;;  %s289_s3 = scalar_lea.vmem [#allocation3], %s3830_s27 }
  0x8a   : > { %s298_s5 = sshll.u32 %s289_s3, 4  ;;  %s5510_s15 = scalar_lea.hbm %s5894_s0, %s3833_s2  ;;  %s5512_s5 = int_to_ptr.vmem [resolvable:$true] %s298_s5 }
  0x8b   : > { %p5518_p7 = pnand %p5921_p9, %p5486_p3  ;;  %s308_s3 = sand.u32 1, %s5225_s14  }
  0x8c   : > { %s5523_s16 = scalar_lea.sflag [#allocation4], %s285_s20  ;;  %s5007_s19 = scalar_lea.hbm %s5510_s15, 256 }
  0x8d   : > { %p5008_p8 = scmp.ne.s32.totalorder %s5510_s15, %s5007_s19  ;;  %p5009_p10 = pneg %p5518_p7 }
  0x8e   : > { %s5012_s24 = scalar_lea.hbm %s5894_s0, 1536  ;;  %p5013_p6 = scmp.lt.u32.totalorder %s5510_s15, %s5894_s0 }
  0x8f   : > { %p5010_p12 = pnand %p5009_p10, %p5008_p8  ;;  %p5014_p1 = scmp.lt.u32.totalorder %s5012_s24, %s5007_s19 }
  0x90   : > { %p5016_p3 = scmp.lt.u32.totalorder %s5007_s19, %s5510_s15 }
  0x91   : > { %p5011_p0 = pneg %p5010_p12  ;;  %p5015_p4 = por %p5014_p1, %p5013_p6 }
  0x93   : > { %p5017_p11 = por %p5016_p3, %p5015_p4 }
  0x95   : > { %p5018_p13 = pnand %p5017_p11, %p5011_p0 }
  0x97   : > { %5021 = shalt.err (!%p5018_p13)
}
  0x98   : > { %s5022_s20 = scalar_lea.vmem %s5512_s5, 256  ;;  %s5234_s7 = smov [#allocation3]  }
  0x99   : > { %p5023_p8 = scmp.ne.s32.totalorder %s5512_s5, %s5022_s20  ;;  %s5027_s27 = sshll.u32 %s5234_s7, 4  ;;  %s5028_s27 = int_to_ptr.vmem [resolvable:$false] %s5027_s27 }
  0x9a   : > { %s5029_s6 = scalar_lea.vmem %s5028_s27, 512  ;;  %p5030_p2 = scmp.lt.s32.totalorder %s5512_s5, %s5028_s27 }
  0x9b   : > { %p5025_p12 = pnand %p5023_p8, %p5009_p10  ;;  %p5031_p6 = scmp.lt.s32.totalorder %s5029_s6, %s5022_s20 }
  0x9d   : > { %p5026_p9 = pneg %p5025_p12  ;;  %p5032_p1 = por %p5031_p6, %p5030_p2 }
  0x9f   : > { %p5033_p4 = pnand %p5032_p1, %p5026_p9 }
  0xa1   : > { %5036 = shalt.err (!%p5033_p4)
}
  0xa2   : > { %s5235_s19 = smov 192   ;;  %s5951_s2 = smov 4  }
  0xa3   : > { %s5952_s25 = smov 64   ;;  %s74_s24 = sadd.s32 1, %s5193_s29 }
  0xa4   : > { %4362 = dma.hbm_to_vmem [thread:$0]  (!%p5518_p7), %s5510_s15, 256, %s5512_s5, %s5523_s16, %s5235_s19, %s5952_s25, %s5951_s2  }
  0xa5   : > { %p81_p2 = scmp.ne.s32.totalorder %s5193_s29, %s5189_s28  ;;  %p5953_p9 = scmp.eq.s32.totalorder %s5225_s14, 0 }
  0xa6   : > { %s5559_s4 = scalar_select %p72_p5, %s5193_s29, %s74_s24  }
  0xa7   : > { %p83_p10 = por %p81_p2, %p5953_p9  ;;  %s310_s23 = sand.u32 1, %s5193_s29  }
  0xa8   : > { %s4208_s21 = sshll.u32 %s5217_s12, 13  ;;  %s3834_s20 = sshll.u32 %s310_s23, 9 }
  0xa9   : > { %s5568_s6 = scalar_lea.hbm %s5895_s1, %s4208_s21  ;;  %p5954_p0 = scmp.lt.s32.totalorder %s5225_s14, 6 }
  0xaa   : > { %s312_s15 = scalar_lea.vmem [#allocation6], %s3834_s20  ;;  %s5580_s16 = scalar_lea.sflag [#allocation7], %s308_s3 }
  0xab   : > { %p5572_p7 = pnand %p5954_p0, %p83_p10  ;;  %s320_s17 = sshll.u32 %s312_s15, 4  ;;  %s5576_s17 = int_to_ptr.vmem [resolvable:$true] %s320_s17 }
  0xac   : > { %s5037_s19 = scalar_lea.hbm %s5568_s6, 8192  ;;  %s5042_s24 = scalar_lea.hbm %s5895_s1, 24576 }
  0xad   : > { %p5038_p5 = scmp.ne.s32.totalorder %s5568_s6, %s5037_s19  ;;  %p5039_p3 = pneg %p5572_p7 }
  0xae   : > { %p5043_p8 = scmp.lt.u32.totalorder %s5568_s6, %s5895_s1  ;;  %p5044_p12 = scmp.lt.u32.totalorder %s5042_s24, %s5037_s19 }
  0xaf   : > { %p5040_p11 = pnand %p5039_p3, %p5038_p5  ;;  %p5046_p1 = scmp.lt.u32.totalorder %s5037_s19, %s5568_s6 }
  0xb0   : > { %p5045_p6 = por %p5044_p12, %p5043_p8 }
  0xb1   : > { %p5041_p13 = pneg %p5040_p11 }
  0xb2   : > { %p5047_p4 = por %p5046_p1, %p5045_p6 }
  0xb4   : > { %p5048_p2 = pnand %p5047_p4, %p5041_p13 }
  0xb6   : > { %5051 = shalt.err (!%p5048_p2)
}
  0xb7   : > { %s5052_s3 = scalar_lea.vmem %s5576_s17, 8192  ;;  %s5236_s20 = smov [#allocation6]  }
  0xb8   : > { %p5053_p9 = scmp.ne.s32.totalorder %s5576_s17, %s5052_s3  ;;  %s5057_s7 = sshll.u32 %s5236_s20, 4  ;;  %s5058_s7 = int_to_ptr.vmem [resolvable:$false] %s5057_s7 }
  0xb9   : > { %s5059_s27 = scalar_lea.vmem %s5058_s7, 16384  ;;  %p5060_p5 = scmp.lt.s32.totalorder %s5576_s17, %s5058_s7 }
  0xba   : > { %p5055_p10 = pnand %p5053_p9, %p5039_p3  ;;  %p5061_p11 = scmp.lt.s32.totalorder %s5059_s27, %s5052_s3 }
  0xbc   : > { %p5056_p0 = pneg %p5055_p10  ;;  %p5062_p8 = por %p5061_p11, %p5060_p5 }
  0xbe   : > { %p5063_p12 = pnand %p5062_p8, %p5056_p0 }
  0xc0   : > { %5066 = shalt.err (!%p5063_p12)
}
  0xc1   : > { %s5237_s15 = smov 512   ;;  %s5238_s19 = smov 32  }
  0xc2   : > { %4365 = dma.hbm_to_vmem [thread:$0]  (!%p5572_p7), %s5568_s6, 8192, %s5576_s17, %s5580_s16, %s5237_s15, %s5237_s15, %s5238_s19  }
  0xc3   : > { %p5956_p3 = scmp.ne.s32.totalorder %s5941_s22, 0 }
  0xc4   : > { %s334_s2 = sand.u32 (!%p5956_p3), 1, %s5201_s8   ;;  %p5957_p13 = scmp.ne.s32.totalorder (!%p5956_p3), %s5934_s18, 0 }
  0xc5   : > { %332 = sbr.rel (%p5956_p3) target bundleno = 1246 (0x4de), region = 48  ;;  %s5611_s25 = sshll.u32 (!%p5956_p3), %s334_s2, 4 }
  0xc6   : > { %s335_s24 = scalar_lea.sflag (!%p5956_p3), [#allocation4], %s334_s2  ;;  %s338_s23 = scalar_lea.vmem (!%p5956_p3), [#allocation3], %s5611_s25 }
  0xcc   : > { %5152 = dma.done.wait (%p5957_p13), %s335_s24, 256  }
  0xcd   : > { %5154 = vsyncadd (%p5957_p13), %s335_s24, 4294967040  ;;  %s5958_s21 = sld [smem:[#allocation22_spill]]  ;;  %s5959_s5 = sld [smem:[#allocation23_spill]] }
  0xce   : > { %s345_s17 = sand.u32 1, %s5189_s28  }
  0xcf   : > { %s3840_s22 = sshll.u32 %s345_s17, 9 }
  0xd0   : > { %s5620_s3 = scalar_lea.vmem [#allocation6], %s3840_s22 }
  0xd3   : > { %s343_s6 = sand.u32 1, %s5958_s21   ;;  %p5960_p7 = scmp.ne.s32.totalorder %s5959_s5, 0 }
  0xd4   : > { %s344_s16 = scalar_lea.sflag [#allocation7], %s343_s6 }
  0xd5   : > { %5156 = dma.done.wait (%p5960_p7), %s344_s16, 8192  }
  0xd6   : > { %5158 = vsyncadd (%p5960_p7), %s344_s16, 4294959104  ;;  %p5961_p6 = scmp.eq.s32.totalorder %s5958_s21, 0 }
  0xd8   : > { %5160 = dma.done.wait (%p5961_p6), [#allocation7], 128   ;;  %p5962_p1 = pmov %p5961_p6 }
  0xda   : > { %5162 = vsyncadd (%p5962_p1), [#allocation7], 4294967168  ;;  %p5963_p4 = pmov %p5962_p1 }
  0xdb   : > { %p5964_p2 = pmov %p5962_p1 }
  0xdc   : > { %5164 = dma.done.wait (%p5963_p4), [#allocation10], 36864  }
  0xdd   : > { %5166 = vsyncadd (%p5964_p2), [#allocation10], 4294930432  ;;  %s5965_s18 = sld [smem:[#allocation19_spill]]  ;;  %s5966_s15 = sld [smem:[#allocation20_spill]] }
  0xe3   : > { %s392_s20 = sand.u32 1, %s5965_s18   ;;  %p3845_p9 = scmp.ne.s32.totalorder %s5966_s15, 0 }
  0xe4   : > { %s3844_s7 = sshll.u32 %s392_s20, 5  ;;  %v5239_v0 = vmov (!%p3845_p9), 0.0  }
  0xe5   : > { %s5637_s27 = scalar_lea.vmem [#allocation12], %s3844_s7  ;;  %402 = sbr.rel (%p3845_p9) target bundleno = 245 (0xf5), region = 72  ;;  %403 = vst [vmem:[#allocation2] sm:$0xff] (!%p3845_p9), %v5239_v0  ;;  %404 = vst [vmem:[#allocation2 + $0x8] sm:$0xff] (!%p3845_p9), %v5239_v0 }
  0xe6   : > { %405 = vst [vmem:[#allocation2 + $0x10] sm:$0xff] (!%p3845_p9), %v5239_v0  ;;  %406 = vst [vmem:[#allocation2 + $0x18] sm:$0xff] (!%p3845_p9), %v5239_v0 }
  0xe7   : > { %407 = vst [vmem:[#allocation2 + $0x20] sm:$0xff] (!%p3845_p9), %v5239_v0  ;;  %408 = vst [vmem:[#allocation2 + $0x28] sm:$0xff] (!%p3845_p9), %v5239_v0 }
  0xe8   : > { %409 = vst [vmem:[#allocation2 + $0x30] sm:$0xff] (!%p3845_p9), %v5239_v0  ;;  %410 = vst [vmem:[#allocation2 + $0x38] sm:$0xff] (!%p3845_p9), %v5239_v0 }
  0xe9   : > { %411 = vst [vmem:[#allocation2 + $0x40] sm:$0xff] (!%p3845_p9), %v5239_v0  ;;  %412 = vst [vmem:[#allocation2 + $0x48] sm:$0xff] (!%p3845_p9), %v5239_v0 }
  0xea   : > { %413 = vst [vmem:[#allocation2 + $0x50] sm:$0xff] (!%p3845_p9), %v5239_v0  ;;  %414 = vst [vmem:[#allocation2 + $0x58] sm:$0xff] (!%p3845_p9), %v5239_v0 }
  0xeb   : > { %415 = vst [vmem:[#allocation2 + $0x60] sm:$0xff] (!%p3845_p9), %v5239_v0  ;;  %416 = vst [vmem:[#allocation2 + $0x68] sm:$0xff] (!%p3845_p9), %v5239_v0 }
  0xec   : > { %417 = vst [vmem:[#allocation2 + $0x70] sm:$0xff] %v5239_v0  ;;  %418 = vst [vmem:[#allocation2 + $0x78] sm:$0xff] %v5239_v0 }
  0xed   : > { %419 = vst [vmem:[#allocation2 + $0x80] sm:$0xff] %v5239_v0  ;;  %420 = vst [vmem:[#allocation2 + $0x88] sm:$0xff] %v5239_v0 }
  0xee   : > { %421 = vst [vmem:[#allocation2 + $0x90] sm:$0xff] %v5239_v0  ;;  %422 = vst [vmem:[#allocation2 + $0x98] sm:$0xff] %v5239_v0 }
  0xef   : > { %423 = vst [vmem:[#allocation2 + $0xa0] sm:$0xff] %v5239_v0  ;;  %424 = vst [vmem:[#allocation2 + $0xa8] sm:$0xff] %v5239_v0 }
  0xf0   : > { %425 = vst [vmem:[#allocation2 + $0xb0] sm:$0xff] %v5239_v0  ;;  %426 = vst [vmem:[#allocation2 + $0xb8] sm:$0xff] %v5239_v0 }
  0xf1   : > { %427 = vst [vmem:[#allocation2 + $0xc0] sm:$0xff] %v5239_v0  ;;  %428 = vst [vmem:[#allocation2 + $0xc8] sm:$0xff] %v5239_v0 }
  0xf2   : > { %429 = vst [vmem:[#allocation2 + $0xd0] sm:$0xff] %v5239_v0  ;;  %430 = vst [vmem:[#allocation2 + $0xd8] sm:$0xff] %v5239_v0 }
  0xf3   : > { %431 = vst [vmem:[#allocation2 + $0xe0] sm:$0xff] %v5239_v0  ;;  %432 = vst [vmem:[#allocation2 + $0xe8] sm:$0xff] %v5239_v0 }
  0xf4   : > { %433 = vst [vmem:[#allocation2 + $0xf0] sm:$0xff] %v5239_v0  ;;  %434 = vst [vmem:[#allocation2 + $0xf8] sm:$0xff] %v5239_v0 }
  0xf5 PF: > { %v471_v1 = vld [vmem:[%s5620_s3] sm:$0xff]  ;;  %v472_v3 = vld [vmem:[%s5620_s3 + $0x8] sm:$0xff]  ;;  %v5240_v9 = vmov 0   ;;  %v473_v0 = vld [vmem:[%s5620_s3 + $0x10] sm:$0xff]  ;;  %s5967_s19 = sld [smem:[#allocation20_spill]] }
  0xf6   : > { %v475_v2 = vld [vmem:[%s5620_s3 + $0x20] sm:$0xff]  ;;  %v476_v5 = vld [vmem:[%s5620_s3 + $0x28] sm:$0xff]  ;;  %899 = vmatprep.mubr.bf16.mxu0 %v5240_v9  ;;  %952 = vmatprep.mubr.bf16.mxu1 %v5240_v9 }
  0xf7   : > { %v3849_v4 = vcombine.high %v471_v1, %v475_v2  ;;  %v3848_v6 = vcombine.low %v471_v1, %v475_v2  ;;  %v479_v7 = vld [vmem:[%s5620_s3 + $0x40] sm:$0xff]  ;;  %v3851_v10 = vcombine.high %v472_v3, %v476_v5  ;;  %v3850_v11 = vcombine.low %v472_v3, %v476_v5  ;;  %v480_v13 = vld [vmem:[%s5620_s3 + $0x48] sm:$0xff]  ;;  %v477_v1 = vld [vmem:[%s5620_s3 + $0x30] sm:$0xff] }
  0xf8   : > { %v483_v8 = vld [vmem:[%s5620_s3 + $0x60] sm:$0xff]  ;;  %v484_v14 = vld [vmem:[%s5620_s3 + $0x68] sm:$0xff]  ;;  %v474_v2 = vld [vmem:[%s5620_s3 + $0x18] sm:$0xff] }
  0xf9   : > { %v3857_v12 = vcombine.high %v479_v7, %v483_v8  ;;  %v487_v15 = vld [vmem:[%s5620_s3 + $0x80] sm:$0xff]  ;;  %867 = vmatprep.subr.bf16.mxu0 %v3849_v4  ;;  %v3859_v16 = vcombine.high %v480_v13, %v484_v14  ;;  %v488_v18 = vld [vmem:[%s5620_s3 + $0x88] sm:$0xff]  ;;  %920 = vmatprep.subr.bf16.mxu1 %v3851_v10  ;;  %v3856_v20 = vcombine.low %v479_v7, %v483_v8  ;;  %v478_v3 = vld [vmem:[%s5620_s3 + $0x38] sm:$0xff] }
  0xfa   : > { %v491_v17 = vld [vmem:[%s5620_s3 + $0xa0] sm:$0xff]  ;;  %v492_v19 = vld [vmem:[%s5620_s3 + $0xa8] sm:$0xff]  ;;  %868 = vmatpush1.bf16.msra.mxu0 %v3848_v6  ;;  %921 = vmatpush1.bf16.msra.mxu1 %v3850_v11  ;;  %v3858_v21 = vcombine.low %v480_v13, %v484_v14  ;;  %v3853_v6 = vcombine.high %v473_v0, %v477_v1  ;;  %v3855_v7 = vcombine.high %v474_v2, %v478_v3  ;;  %v481_v8 = vld [vmem:[%s5620_s3 + $0x50] sm:$0xff] }
  0xfb   : > { %869 = vmatprep.subr.bf16.mxu0 %v3857_v12  ;;  %v3865_v22 = vcombine.high %v487_v15, %v491_v17  ;;  %922 = vmatprep.subr.bf16.mxu1 %v3859_v16  ;;  %v3867_v23 = vcombine.high %v488_v18, %v492_v19  ;;  %v495_v24 = vld [vmem:[%s5620_s3 + $0xc0] sm:$0xff]  ;;  %v496_v26 = vld [vmem:[%s5620_s3 + $0xc8] sm:$0xff]  ;;  %v3864_v28 = vcombine.low %v487_v15, %v491_v17  ;;  %v485_v10 = vld [vmem:[%s5620_s3 + $0x70] sm:$0xff]  ;;  %p3912_p10 = scmp.ne.s32.totalorder %s5967_s19, 2 }
  0xfc   : > { %v499_v25 = vld [vmem:[%s5620_s3 + $0xe0] sm:$0xff]  ;;  %v500_v27 = vld [vmem:[%s5620_s3 + $0xe8] sm:$0xff]  ;;  %v3866_v29 = vcombine.low %v488_v18, %v492_v19  ;;  %v482_v12 = vld [vmem:[%s5620_s3 + $0x58] sm:$0xff]  ;;  %v3852_v14 = vcombine.low %v473_v0, %v477_v1  ;;  %v3854_v15 = vcombine.low %v474_v2, %v478_v3  ;;  %v3861_v16 = vcombine.high %v481_v8, %v485_v10  ;;  %s5968_s24 = sld [smem:[#allocation29_spill]] (!%p3912_p10)  ;;  %s5969_s5 = sld [smem:[#allocation31_spill]] (!%p3912_p10) }
  0xfd   : > { %v3873_v30 = vcombine.high %v495_v24, %v499_v25  ;;  %v3875_v31 = vcombine.high %v496_v26, %v500_v27  ;;  %v503_v32 = vld [vmem:[%s5620_s3 + $0x100] sm:$0xff]  ;;  %v504_v34 = vld [vmem:[%s5620_s3 + $0x108] sm:$0xff]  ;;  %v3872_v36 = vcombine.low %v495_v24, %v499_v25  ;;  %v3874_v37 = vcombine.low %v496_v26, %v500_v27  ;;  %v486_v13 = vld [vmem:[%s5620_s3 + $0x78] sm:$0xff] }
  0xfe   : > { %870 = vmatpush1.bf16.msra.mxu0 %v3856_v20  ;;  %923 = vmatpush1.bf16.msra.mxu1 %v3858_v21  ;;  %v507_v33 = vld [vmem:[%s5620_s3 + $0x120] sm:$0xff]  ;;  %v508_v35 = vld [vmem:[%s5620_s3 + $0x128] sm:$0xff]  ;;  %v3863_v17 = vcombine.high %v482_v12, %v486_v13  ;;  %v489_v18 = vld [vmem:[%s5620_s3 + $0x90] sm:$0xff] }
  0xff   : > { %871 = vmatprep.subr.bf16.mxu0 %v3865_v22  ;;  %924 = vmatprep.subr.bf16.mxu1 %v3867_v23  ;;  %v3881_v38 = vcombine.high %v503_v32, %v507_v33  ;;  %v3883_v39 = vcombine.high %v504_v34, %v508_v35  ;;  %v511_v40 = vld [vmem:[%s5620_s3 + $0x140] sm:$0xff]  ;;  %v512_v42 = vld [vmem:[%s5620_s3 + $0x148] sm:$0xff]  ;;  %v3880_v44 = vcombine.low %v503_v32, %v507_v33  ;;  %v493_v19 = vld [vmem:[%s5620_s3 + $0xb0] sm:$0xff] }
 0x100   : > { %v515_v41 = vld [vmem:[%s5620_s3 + $0x160] sm:$0xff]  ;;  %v516_v43 = vld [vmem:[%s5620_s3 + $0x168] sm:$0xff]  ;;  %v3882_v45 = vcombine.low %v504_v34, %v508_v35  ;;  %v490_v20 = vld [vmem:[%s5620_s3 + $0x98] sm:$0xff]  ;;  %v3860_v22 = vcombine.low %v481_v8, %v485_v10  ;;  %v3862_v23 = vcombine.low %v482_v12, %v486_v13  ;;  %v3869_v24 = vcombine.high %v489_v18, %v493_v19 }
 0x101   : > { %v3889_v46 = vcombine.high %v511_v40, %v515_v41  ;;  %v3891_v47 = vcombine.high %v512_v42, %v516_v43  ;;  %v519_v48 = vld [vmem:[%s5620_s3 + $0x180] sm:$0xff]  ;;  %v520_v50 = vld [vmem:[%s5620_s3 + $0x188] sm:$0xff]  ;;  %v3888_v52 = vcombine.low %v511_v40, %v515_v41  ;;  %v3890_v53 = vcombine.low %v512_v42, %v516_v43  ;;  %v494_v21 = vld [vmem:[%s5620_s3 + $0xb8] sm:$0xff] }
 0x102   : > { %872 = vmatpush1.bf16.msra.mxu0 %v3864_v28  ;;  %925 = vmatpush1.bf16.msra.mxu1 %v3866_v29  ;;  %v523_v49 = vld [vmem:[%s5620_s3 + $0x1a0] sm:$0xff]  ;;  %v524_v51 = vld [vmem:[%s5620_s3 + $0x1a8] sm:$0xff]  ;;  %v3871_v25 = vcombine.high %v490_v20, %v494_v21  ;;  %v497_v26 = vld [vmem:[%s5620_s3 + $0xd0] sm:$0xff]  ;;  %v3870_v32 = vcombine.low %v490_v20, %v494_v21 }
 0x103   : > { %873 = vmatprep.subr.bf16.mxu0 %v3873_v30  ;;  %926 = vmatprep.subr.bf16.mxu1 %v3875_v31  ;;  %v3897_v54 = vcombine.high %v519_v48, %v523_v49  ;;  %v3899_v55 = vcombine.high %v520_v50, %v524_v51  ;;  %v527_v56 = vld [vmem:[%s5620_s3 + $0x1c0] sm:$0xff]  ;;  %v528_v58 = vld [vmem:[%s5620_s3 + $0x1c8] sm:$0xff]  ;;  %v3896_v60 = vcombine.low %v519_v48, %v523_v49  ;;  %v501_v27 = vld [vmem:[%s5620_s3 + $0xf0] sm:$0xff] }
 0x104   : > { %v531_v57 = vld [vmem:[%s5620_s3 + $0x1e0] sm:$0xff]  ;;  %v532_v59 = vld [vmem:[%s5620_s3 + $0x1e8] sm:$0xff]  ;;  %v3898_v61 = vcombine.low %v520_v50, %v524_v51  ;;  %v498_v28 = vld [vmem:[%s5620_s3 + $0xd8] sm:$0xff]  ;;  %v3868_v31 = vcombine.low %v489_v18, %v493_v19  ;;  %v3877_v33 = vcombine.high %v497_v26, %v501_v27 }
 0x105   : > { %v3905_v62 = vcombine.high %v527_v56, %v531_v57  ;;  %v3907_v63 = vcombine.high %v528_v58, %v532_v59  ;;  %v3904_v4 = vcombine.low %v527_v56, %v531_v57  ;;  %v3906_v5 = vcombine.low %v528_v58, %v532_v59  ;;  %v5682_v11 = vld [vmem:[%s338_s23] sm:$0xff]   ;;  %v502_v29 = vld [vmem:[%s5620_s3 + $0xf8] sm:$0xff] }
 0x106   : > { %874 = vmatpush1.bf16.msra.mxu0 %v3872_v36  ;;  %927 = vmatpush1.bf16.msra.mxu1 %v3874_v37  ;;  %v5700_v30 = vld [vmem:[%s338_s23 + $0x8] sm:$0xff]   ;;  %v3879_v34 = vcombine.high %v498_v28, %v502_v29  ;;  %v505_v35 = vld [vmem:[%s5620_s3 + $0x110] sm:$0xff]  ;;  %v3878_v40 = vcombine.low %v498_v28, %v502_v29  ;;  %v443_v12 = vld [vmem:[#allocation2 + $0x40] sm:$0xff] }
 0x107   : > { %875 = vmatprep.subr.bf16.mxu0 %v3881_v38  ;;  %928 = vmatprep.subr.bf16.mxu1 %v3883_v39  ;;  %v509_v36 = vld [vmem:[%s5620_s3 + $0x130] sm:$0xff]  ;;  %v506_v37 = vld [vmem:[%s5620_s3 + $0x118] sm:$0xff]  ;;  %v3876_v39 = vcombine.low %v497_v26, %v501_v27  ;;  %v451_v29 = vld [vmem:[#allocation2 + $0x80] sm:$0xff] }
 0x108   : > { %v510_v38 = vld [vmem:[%s5620_s3 + $0x138] sm:$0xff]  ;;  %v3885_v41 = vcombine.high %v505_v35, %v509_v36  ;;  %v513_v43 = vld [vmem:[%s5620_s3 + $0x150] sm:$0xff] }
 0x109   : > { %v3887_v42 = vcombine.high %v506_v37, %v510_v38  ;;  %v3886_v48 = vcombine.low %v506_v37, %v510_v38  ;;  %v521_v51 = vld [vmem:[%s5620_s3 + $0x190] sm:$0xff]  ;;  %v438_v10 = vld [vmem:[#allocation2 + $0x18] sm:$0xff] }
 0x10a   : > { %876 = vmatpush1.bf16.msra.mxu0 %v3880_v44  ;;  %929 = vmatpush1.bf16.msra.mxu1 %v3882_v45  ;;  %v517_v44 = vld [vmem:[%s5620_s3 + $0x170] sm:$0xff]  ;;  %v514_v45 = vld [vmem:[%s5620_s3 + $0x158] sm:$0xff] }
 0x10b   : > { %877 = vmatprep.subr.bf16.mxu0 %v3889_v46  ;;  %930 = vmatprep.subr.bf16.mxu1 %v3891_v47  ;;  %v518_v46 = vld [vmem:[%s5620_s3 + $0x178] sm:$0xff]  ;;  %v3884_v47 = vcombine.low %v505_v35, %v509_v36  ;;  %v3893_v49 = vcombine.high %v513_v43, %v517_v44  ;;  %v529_v59 = vld [vmem:[%s5620_s3 + $0x1d0] sm:$0xff] }
 0x10c   : > { %v3895_v50 = vcombine.high %v514_v45, %v518_v46  ;;  %v3894_v56 = vcombine.low %v514_v45, %v518_v46  ;;  %v461_v38 = vld [vmem:[#allocation2 + $0xd0] sm:$0xff] }
 0x10e   : > { %878 = vmatpush1.bf16.msra.mxu0 %v3888_v52  ;;  %931 = vmatpush1.bf16.msra.mxu1 %v3890_v53  ;;  %v525_v52 = vld [vmem:[%s5620_s3 + $0x1b0] sm:$0xff]  ;;  %v522_v53 = vld [vmem:[%s5620_s3 + $0x198] sm:$0xff] }
 0x10f   : > { %879 = vmatprep.subr.bf16.mxu0 %v3897_v54  ;;  %932 = vmatprep.subr.bf16.mxu1 %v3899_v55  ;;  %v526_v54 = vld [vmem:[%s5620_s3 + $0x1b8] sm:$0xff]  ;;  %v3892_v55 = vcombine.low %v513_v43, %v517_v44  ;;  %v3901_v57 = vcombine.high %v521_v51, %v525_v52 }
 0x110   : > { %v3903_v58 = vcombine.high %v522_v53, %v526_v54  ;;  %v3902_v0 = vcombine.low %v522_v53, %v526_v54  ;;  %v462_v44 = vld [vmem:[#allocation2 + $0xd8] sm:$0xff]  ;;  %v439_v53 = vld [vmem:[#allocation2 + $0x20] sm:$0xff]  ;;  %v441_v54 = vld [vmem:[#allocation2 + $0x30] sm:$0xff] }
 0x112   : > { %880 = vmatpush1.bf16.msra.mxu0 %v3896_v60  ;;  %933 = vmatpush1.bf16.msra.mxu1 %v3898_v61  ;;  %v533_v60 = vld [vmem:[%s5620_s3 + $0x1f0] sm:$0xff]  ;;  %v530_v61 = vld [vmem:[%s5620_s3 + $0x1d8] sm:$0xff] }
 0x113   : > { %881 = vmatprep.subr.bf16.mxu0 %v3905_v62  ;;  %934 = vmatprep.subr.bf16.mxu1 %v3907_v63  ;;  %v534_v62 = vld [vmem:[%s5620_s3 + $0x1f8] sm:$0xff]  ;;  %v3900_v63 = vcombine.low %v521_v51, %v525_v52  ;;  %v3909_v1 = vcombine.high %v529_v59, %v533_v60  ;;  %v3908_v3 = vcombine.low %v529_v59, %v533_v60 }
 0x114   : > { %v3911_v2 = vcombine.high %v530_v61, %v534_v62 }
 0x116   : > { %882 = vmatpush1.bf16.msra.mxu0 %v3904_v4  ;;  %935 = vmatpush1.bf16.msra.mxu1 %v3906_v5  ;;  %v3910_v4 = vcombine.low %v530_v61, %v534_v62  ;;  %v435_v5 = vld [vmem:[#allocation2] sm:$0xff]  ;;  %v449_v62 = vld [vmem:[#allocation2 + $0x70] sm:$0xff] }
 0x117   : > { %973 = vmatprep.subr.bf16.mxu0 %v3853_v6  ;;  %1026 = vmatprep.subr.bf16.mxu1 %v3855_v7  ;;  %v437_v6 = vld [vmem:[#allocation2 + $0x10] sm:$0xff]  ;;  %v436_v7 = vld [vmem:[#allocation2 + $0x8] sm:$0xff] }
 0x119   : > { %900 = vmatmul.mubr.bf16.vlgmr.msra.gmra.mrb[0].mxu0 %v5682_v11  ;;  %953 = vmatmul.mubr.bf16.vlgmr.msra.gmra.mrb[0].mxu1 %v5682_v11 }
 0x11a   : > { %974 = vmatpush1.bf16.msra.mxu0 %v3852_v14  ;;  %1027 = vmatpush1.bf16.msra.mxu1 %v3854_v15 }
 0x11b   : > { %975 = vmatprep.subr.bf16.mxu0 %v3861_v16  ;;  %1028 = vmatprep.subr.bf16.mxu1 %v3863_v17  ;;  %v445_v16 = vld [vmem:[#allocation2 + $0x50] sm:$0xff]  ;;  %v444_v17 = vld [vmem:[#allocation2 + $0x48] sm:$0xff] }
 0x11c   : > { %909 = vmatprep.mubr.bf16.mxu0 %v5240_v9  ;;  %962 = vmatprep.mubr.bf16.mxu1 %v5240_v9 }
 0x11e   : > { %976 = vmatpush1.bf16.msra.mxu0 %v3860_v22  ;;  %1029 = vmatpush1.bf16.msra.mxu1 %v3862_v23 }
 0x11f   : > { %977 = vmatprep.subr.bf16.mxu0 %v3869_v24  ;;  %1030 = vmatprep.subr.bf16.mxu1 %v3871_v25 }
 0x121   : > { %910 = vmatmul.mubr.bf16.gmra.mrb[4].mxu0 %v5700_v30  ;;  %963 = vmatmul.mubr.bf16.gmra.mrb[4].mxu1 %v5700_v30 }
 0x122   : > { %978 = vmatpush1.bf16.msra.mxu0 %v3868_v31  ;;  %1031 = vmatpush1.bf16.msra.mxu1 %v3870_v32  ;;  %v452_v31 = vld [vmem:[#allocation2 + $0x88] sm:$0xff] }
 0x123   : > { %979 = vmatprep.subr.bf16.mxu0 %v3877_v33  ;;  %1032 = vmatprep.subr.bf16.mxu1 %v3879_v34  ;;  %v454_v33 = vld [vmem:[#allocation2 + $0x98] sm:$0xff]  ;;  %v459_v34 = vld [vmem:[#allocation2 + $0xc0] sm:$0xff] }
 0x124   : > { %1005 = vmatprep.mubr.bf16.mxu0 %v5240_v9  ;;  %1058 = vmatprep.mubr.bf16.mxu1 %v5240_v9 }
 0x126   : > { %980 = vmatpush1.bf16.msra.mxu0 %v3876_v39  ;;  %1033 = vmatpush1.bf16.msra.mxu1 %v3878_v40  ;;  %v460_v39 = vld [vmem:[#allocation2 + $0xc8] sm:$0xff] }
 0x127   : > { %981 = vmatprep.subr.bf16.mxu0 %v3885_v41  ;;  %1034 = vmatprep.subr.bf16.mxu1 %v3887_v42 }
 0x12a   : > { %982 = vmatpush1.bf16.msra.mxu0 %v3884_v47  ;;  %1035 = vmatpush1.bf16.msra.mxu1 %v3886_v48 }
 0x12b   : > { %983 = vmatprep.subr.bf16.mxu0 %v3893_v49  ;;  %1036 = vmatprep.subr.bf16.mxu1 %v3895_v50 }
 0x12e   : > { %984 = vmatpush1.bf16.msra.mxu0 %v3892_v55  ;;  %1037 = vmatpush1.bf16.msra.mxu1 %v3894_v56  ;;  %v440_v55 = vld [vmem:[#allocation2 + $0x28] sm:$0xff] }
 0x12f   : > { %985 = vmatprep.subr.bf16.mxu0 %v3901_v57  ;;  %1038 = vmatprep.subr.bf16.mxu1 %v3903_v58  ;;  %v442_v57 = vld [vmem:[#allocation2 + $0x38] sm:$0xff]  ;;  %v447_v58 = vld [vmem:[#allocation2 + $0x60] sm:$0xff] }
 0x132   : > { %986 = vmatpush1.bf16.msra.mxu0 %v3900_v63  ;;  %1039 = vmatpush1.bf16.msra.mxu1 %v3902_v0  ;;  %v448_v63 = vld [vmem:[#allocation2 + $0x68] sm:$0xff] }
 0x133   : > { %987 = vmatprep.subr.bf16.mxu0 %v3909_v1  ;;  %1040 = vmatprep.subr.bf16.mxu1 %v3911_v2 }
 0x136   : > { %988 = vmatpush1.bf16.msra.mxu0 %v3908_v3  ;;  %1041 = vmatpush1.bf16.msra.mxu1 %v3910_v4  ;;  %v450_v4 = vld [vmem:[#allocation2 + $0x78] sm:$0xff] }
 0x139   : > { %1006 = vmatmul.mubr.bf16.vlgmr.msra.gmra.mrb[8].mxu0 %v5682_v11  ;;  %1059 = vmatmul.mubr.bf16.vlgmr.msra.gmra.mrb[8].mxu1 %v5682_v11 }
 0x13a   : > { %1015 = vmatprep.mubr.bf16.mxu0 %v5240_v9  ;;  %1068 = vmatprep.mubr.bf16.mxu1 %v5240_v9  ;;  %v446_v9 = vld [vmem:[#allocation2 + $0x58] sm:$0xff] }
 0x141   : > { %1016 = vmatmul.mubr.bf16.gmra.mrb[12].mxu0 %v5700_v30  ;;  %1069 = vmatmul.mubr.bf16.gmra.mrb[12].mxu1 %v5700_v30  ;;  %v453_v30 = vld [vmem:[#allocation2 + $0x90] sm:$0xff] }
 0x1ec   : > { %v901_v8 = vpop.f32.mrb[0].mxu0  ;;  %v954_v14 = vpop.f32.mrb[0].mxu1 }
 0x1ed   : > { %v1079_v13 = vadd.f32 %v901_v8, %v435_v5  ;;  %v903_v15 = vpop.f32.mrb[1].mxu0  ;;  %v1081_v11 = vadd.f32 %v954_v14, %v437_v6  ;;  %v956_v19 = vpop.f32.mrb[1].mxu1 }
 0x1ee   : > { %v1080_v18 = vadd.f32 %v903_v15, %v436_v7  ;;  %v905_v20 = vpop.f32.mrb[2].mxu0  ;;  %v1082_v21 = vadd.f32 %v956_v19, %v438_v10  ;;  %v958_v23 = vpop.f32.mrb[2].mxu1  ;;  %v455_v15 = vld [vmem:[#allocation2 + $0xa0] sm:$0xff] }
 0x1ef   : > { %1111 = vst [vmem:[#allocation2] sm:$0xff] %v1079_v13  ;;  %v1087_v22 = vadd.f32 %v905_v20, %v443_v12  ;;  %v907_v24 = vpop.f32.mrb[3].mxu0  ;;  %1113 = vst [vmem:[#allocation2 + $0x10] sm:$0xff] %v1081_v11  ;;  %v1089_v25 = vadd.f32 %v958_v23, %v445_v16  ;;  %v960_v27 = vpop.f32.mrb[3].mxu1  ;;  %v457_v16 = vld [vmem:[#allocation2 + $0xb0] sm:$0xff]  ;;  %v463_v19 = vld [vmem:[#allocation2 + $0xe0] sm:$0xff] }
 0x1f0   : > { %1112 = vst [vmem:[#allocation2 + $0x8] sm:$0xff] %v1080_v18  ;;  %v1088_v26 = vadd.f32 %v907_v24, %v444_v17  ;;  %1114 = vst [vmem:[#allocation2 + $0x18] sm:$0xff] %v1082_v21  ;;  %v1090_v28 = vadd.f32 %v960_v27, %v446_v9  ;;  %v456_v17 = vld [vmem:[#allocation2 + $0xa8] sm:$0xff]  ;;  %v458_v18 = vld [vmem:[#allocation2 + $0xb8] sm:$0xff] }
 0x1f1   : > { %1119 = vst [vmem:[#allocation2 + $0x40] sm:$0xff] %v1087_v22  ;;  %1121 = vst [vmem:[#allocation2 + $0x50] sm:$0xff] %v1089_v25  ;;  %v465_v22 = vld [vmem:[#allocation2 + $0xf0] sm:$0xff]  ;;  %v464_v23 = vld [vmem:[#allocation2 + $0xe8] sm:$0xff] }
 0x1f2   : > { %1120 = vst [vmem:[#allocation2 + $0x48] sm:$0xff] %v1088_v26  ;;  %1122 = vst [vmem:[#allocation2 + $0x58] sm:$0xff] %v1090_v28  ;;  %v466_v28 = vld [vmem:[#allocation2 + $0xf8] sm:$0xff] }
 0x1f4   : > { %v911_v32 = vpop.f32.mrb[4].mxu0  ;;  %v964_v36 = vpop.f32.mrb[4].mxu1 }
 0x1f5   : > { %v1095_v35 = vadd.f32 %v911_v32, %v451_v29  ;;  %v913_v37 = vpop.f32.mrb[5].mxu0  ;;  %v1097_v40 = vadd.f32 %v964_v36, %v453_v30  ;;  %v966_v42 = vpop.f32.mrb[5].mxu1 }
 0x1f6   : > { %v1096_v41 = vadd.f32 %v913_v37, %v452_v31  ;;  %v915_v43 = vpop.f32.mrb[6].mxu0  ;;  %v1098_v45 = vadd.f32 %v966_v42, %v454_v33  ;;  %v968_v47 = vpop.f32.mrb[6].mxu1  ;;  %v4506_v37 = vld [vmem:[#allocation9 + $0x4] ss:$16 sps:$4 sm:$0xff] (!%p3912_p10)   ;;  %v4514_v42 = vld [vmem:[#allocation9 + $0x2c] ss:$16 sps:$4 sm:$0xff] (!%p3912_p10)  }
 0x1f7   : > { %1127 = vst [vmem:[#allocation2 + $0x80] sm:$0xff] %v1095_v35  ;;  %v1103_v46 = vadd.f32 %v915_v43, %v459_v34  ;;  %v917_v48 = vpop.f32.mrb[7].mxu0  ;;  %1129 = vst [vmem:[#allocation2 + $0x90] sm:$0xff] %v1097_v40  ;;  %v1105_v49 = vadd.f32 %v968_v47, %v461_v38  ;;  %v970_v51 = vpop.f32.mrb[7].mxu1  ;;  %v4508_v38 = vld [vmem:[#allocation9 + $0xc] ss:$16 sps:$4 sm:$0xff] (!%p3912_p10)   ;;  %2859 = vmatprep.subr.bf16.mxu0 (!%p3912_p10), %v4506_v37 }
 0x1f8   : > { %1128 = vst [vmem:[#allocation2 + $0x88] sm:$0xff] %v1096_v41  ;;  %v1104_v50 = vadd.f32 %v917_v48, %v460_v39  ;;  %1130 = vst [vmem:[#allocation2 + $0x98] sm:$0xff] %v1098_v45  ;;  %v1106_v52 = vadd.f32 %v970_v51, %v462_v44  ;;  %v4510_v39 = vld [vmem:[#allocation9] ss:$16 sps:$4 sm:$0xff] (!%p3912_p10)   ;;  %v4511_v40 = vld [vmem:[#allocation9 + $0x8] ss:$16 sps:$4 sm:$0xff] (!%p3912_p10)   ;;  %3071 = vmatprep.subr.bf16.mxu1 (!%p3912_p10), %v4508_v38 }
 0x1f9   : > { %1135 = vst [vmem:[#allocation2 + $0xc0] sm:$0xff] %v1103_v46  ;;  %1137 = vst [vmem:[#allocation2 + $0xd0] sm:$0xff] %v1105_v49  ;;  %v4512_v41 = vld [vmem:[#allocation9 + $0x24] ss:$16 sps:$4 sm:$0xff] (!%p3912_p10)   ;;  %2860 = vmatpush1.bf16.msra.mxu0 (!%p3912_p10), %v4510_v39  ;;  %3072 = vmatpush1.bf16.msra.mxu1 (!%p3912_p10), %v4511_v40  ;;  %v4516_v43 = vld [vmem:[#allocation9 + $0x20] ss:$16 sps:$4 sm:$0xff] (!%p3912_p10)  }
 0x1fa   : > { %1136 = vst [vmem:[#allocation2 + $0xc8] sm:$0xff] %v1104_v50  ;;  %1138 = vst [vmem:[#allocation2 + $0xd8] sm:$0xff] %v1106_v52  ;;  %2861 = vmatprep.subr.bf16.mxu0 (!%p3912_p10), %v4512_v41  ;;  %v4517_v44 = vld [vmem:[#allocation9 + $0x28] ss:$16 sps:$4 sm:$0xff] (!%p3912_p10)   ;;  %3073 = vmatprep.subr.bf16.mxu1 (!%p3912_p10), %v4514_v42  ;;  %v4518_v45 = vld [vmem:[#allocation9 + $0x44] ss:$16 sps:$4 sm:$0xff] (!%p3912_p10)  }
 0x1fb   : > { %v4520_v46 = vld [vmem:[#allocation9 + $0x4c] ss:$16 sps:$4 sm:$0xff] (!%p3912_p10)   ;;  %v4522_v47 = vld [vmem:[#allocation9 + $0x40] ss:$16 sps:$4 sm:$0xff] (!%p3912_p10)   ;;  %v4523_v48 = vld [vmem:[#allocation9 + $0x48] ss:$16 sps:$4 sm:$0xff] (!%p3912_p10)  }
 0x1fc   : > { %v4524_v49 = vld [vmem:[#allocation9 + $0x64] ss:$16 sps:$4 sm:$0xff] (!%p3912_p10)   ;;  %v4526_v50 = vld [vmem:[#allocation9 + $0x6c] ss:$16 sps:$4 sm:$0xff] (!%p3912_p10)   ;;  %v4528_v51 = vld [vmem:[#allocation9 + $0x60] ss:$16 sps:$4 sm:$0xff] (!%p3912_p10)  }
 0x1fd   : > { %2862 = vmatpush1.bf16.msra.mxu0 (!%p3912_p10), %v4516_v43  ;;  %3074 = vmatpush1.bf16.msra.mxu1 (!%p3912_p10), %v4517_v44  ;;  %v4529_v52 = vld [vmem:[#allocation9 + $0x68] ss:$16 sps:$4 sm:$0xff] (!%p3912_p10)   ;;  %v4584_v37 = vld [vmem:[#allocation9 + $0x1a4] ss:$16 sps:$4 sm:$0xff] (!%p3912_p10)   ;;  %v4586_v38 = vld [vmem:[#allocation9 + $0x1ac] ss:$16 sps:$4 sm:$0xff] (!%p3912_p10)  }
 0x1fe   : > { %2863 = vmatprep.subr.bf16.mxu0 (!%p3912_p10), %v4518_v45  ;;  %3075 = vmatprep.subr.bf16.mxu1 (!%p3912_p10), %v4520_v46  ;;  %v4588_v39 = vld [vmem:[#allocation9 + $0x1a0] ss:$16 sps:$4 sm:$0xff] (!%p3912_p10)   ;;  %v4589_v41 = vld [vmem:[#allocation9 + $0x1a8] ss:$16 sps:$4 sm:$0xff] (!%p3912_p10)   ;;  %v4590_v45 = vld [vmem:[#allocation9 + $0x1c4] ss:$16 sps:$4 sm:$0xff] (!%p3912_p10)  }
 0x1ff   : > { %v1147_v43 = vld [vmem:[#allocation2] sm:$0xff] (!%p3912_p10) }
 0x200   : > { %v1155_v44 = vld [vmem:[#allocation2 + $0x40] sm:$0xff] (!%p3912_p10) }
 0x201   : > { %2864 = vmatpush1.bf16.msra.mxu0 (!%p3912_p10), %v4522_v47  ;;  %3076 = vmatpush1.bf16.msra.mxu1 (!%p3912_p10), %v4523_v48  ;;  %v4592_v46 = vld [vmem:[#allocation9 + $0x1cc] ss:$16 sps:$4 sm:$0xff] (!%p3912_p10)  }
 0x202   : > { %2865 = vmatprep.subr.bf16.mxu0 (!%p3912_p10), %v4524_v49  ;;  %3077 = vmatprep.subr.bf16.mxu1 (!%p3912_p10), %v4526_v50  ;;  %v4594_v49 = vld [vmem:[#allocation9 + $0x1c0] ss:$16 sps:$4 sm:$0xff] (!%p3912_p10)   ;;  %v4595_v50 = vld [vmem:[#allocation9 + $0x1c8] ss:$16 sps:$4 sm:$0xff] (!%p3912_p10)  }
 0x205   : > { %2866 = vmatpush1.bf16.msra.mxu0 (!%p3912_p10), %v4528_v51  ;;  %3078 = vmatpush1.bf16.msra.mxu1 (!%p3912_p10), %v4529_v52  ;;  %v4596_v51 = vld [vmem:[#allocation9 + $0x1e4] ss:$16 sps:$4 sm:$0xff] (!%p3912_p10)   ;;  %v4598_v52 = vld [vmem:[#allocation9 + $0x1ec] ss:$16 sps:$4 sm:$0xff] (!%p3912_p10)  }
 0x20c   : > { %v1007_v56 = vpop.f32.mrb[8].mxu0  ;;  %v1060_v60 = vpop.f32.mrb[8].mxu1 }
 0x20d   : > { %v1083_v59 = vadd.f32 %v1007_v56, %v439_v53  ;;  %v1009_v61 = vpop.f32.mrb[9].mxu0  ;;  %v1085_v0 = vadd.f32 %v1060_v60, %v441_v54  ;;  %v1062_v2 = vpop.f32.mrb[9].mxu1  ;;  %v4530_v53 = vld [vmem:[#allocation9 + $0x84] ss:$16 sps:$4 sm:$0xff] (!%p3912_p10)   ;;  %v4532_v54 = vld [vmem:[#allocation9 + $0x8c] ss:$16 sps:$4 sm:$0xff] (!%p3912_p10)  }
 0x20e   : > { %v1084_v1 = vadd.f32 %v1009_v61, %v440_v55  ;;  %v1011_v3 = vpop.f32.mrb[10].mxu0  ;;  %v1086_v5 = vadd.f32 %v1062_v2, %v442_v57  ;;  %v1064_v7 = vpop.f32.mrb[10].mxu1  ;;  %v4534_v55 = vld [vmem:[#allocation9 + $0x80] ss:$16 sps:$4 sm:$0xff] (!%p3912_p10)   ;;  %v4535_v56 = vld [vmem:[#allocation9 + $0x88] ss:$16 sps:$4 sm:$0xff] (!%p3912_p10)   ;;  %2867 = vmatprep.subr.bf16.mxu0 (!%p3912_p10), %v4530_v53  ;;  %3079 = vmatprep.subr.bf16.mxu1 (!%p3912_p10), %v4532_v54 }
 0x20f   : > { %1115 = vst [vmem:[#allocation2 + $0x20] sm:$0xff] %v1083_v59  ;;  %v1091_v6 = vadd.f32 %v1011_v3, %v447_v58  ;;  %v1013_v8 = vpop.f32.mrb[11].mxu0  ;;  %1117 = vst [vmem:[#allocation2 + $0x30] sm:$0xff] %v1085_v0  ;;  %v1093_v10 = vadd.f32 %v1064_v7, %v449_v62  ;;  %v1066_v13 = vpop.f32.mrb[11].mxu1  ;;  %v4536_v57 = vld [vmem:[#allocation9 + $0xa4] ss:$16 sps:$4 sm:$0xff] (!%p3912_p10)   ;;  %2868 = vmatpush1.bf16.msra.mxu0 (!%p3912_p10), %v4534_v55  ;;  %3080 = vmatpush1.bf16.msra.mxu1 (!%p3912_p10), %v4535_v56 }
 0x210   : > { %1116 = vst [vmem:[#allocation2 + $0x28] sm:$0xff] %v1084_v1  ;;  %v1092_v12 = vadd.f32 %v1013_v8, %v448_v63  ;;  %1118 = vst [vmem:[#allocation2 + $0x38] sm:$0xff] %v1086_v5  ;;  %v1094_v14 = vadd.f32 %v1066_v13, %v450_v4  ;;  %v4538_v58 = vld [vmem:[#allocation9 + $0xac] ss:$16 sps:$4 sm:$0xff] (!%p3912_p10)   ;;  %v4540_v59 = vld [vmem:[#allocation9 + $0xa0] ss:$16 sps:$4 sm:$0xff] (!%p3912_p10)   ;;  %2869 = vmatprep.subr.bf16.mxu0 (!%p3912_p10), %v4536_v57 }
 0x211   : > { %1123 = vst [vmem:[#allocation2 + $0x60] sm:$0xff] %v1091_v6  ;;  %1125 = vst [vmem:[#allocation2 + $0x70] sm:$0xff] %v1093_v10  ;;  %v4541_v60 = vld [vmem:[#allocation9 + $0xa8] ss:$16 sps:$4 sm:$0xff] (!%p3912_p10)   ;;  %v4542_v61 = vld [vmem:[#allocation9 + $0xc4] ss:$16 sps:$4 sm:$0xff] (!%p3912_p10)   ;;  %3081 = vmatprep.subr.bf16.mxu1 (!%p3912_p10), %v4538_v58 }
 0x212   : > { %1124 = vst [vmem:[#allocation2 + $0x68] sm:$0xff] %v1092_v12  ;;  %1126 = vst [vmem:[#allocation2 + $0x78] sm:$0xff] %v1094_v14  ;;  %v4544_v62 = vld [vmem:[#allocation9 + $0xcc] ss:$16 sps:$4 sm:$0xff] (!%p3912_p10)   ;;  %v4546_v63 = vld [vmem:[#allocation9 + $0xc0] ss:$16 sps:$4 sm:$0xff] (!%p3912_p10)   ;;  %v1181_v12 = vlaneseq (!%p3912_p10) }
 0x213   : > { %v4547_v0 = vld [vmem:[#allocation9 + $0xc8] ss:$16 sps:$4 sm:$0xff] (!%p3912_p10)   ;;  %2870 = vmatpush1.bf16.msra.mxu0 (!%p3912_p10), %v4540_v59  ;;  %3082 = vmatpush1.bf16.msra.mxu1 (!%p3912_p10), %v4541_v60  ;;  %v4548_v1 = vld [vmem:[#allocation9 + $0xe4] ss:$16 sps:$4 sm:$0xff] (!%p3912_p10)   ;;  %v4550_v2 = vld [vmem:[#allocation9 + $0xec] ss:$16 sps:$4 sm:$0xff] (!%p3912_p10)  }
 0x214   : > { %v1017_v11 = vpop.f32.mrb[12].mxu0  ;;  %v1070_v9 = vpop.f32.mrb[12].mxu1  ;;  %1146 = sbr.rel (%p3912_p10) target bundleno = 1218 (0x4c2), region = 76  ;;  %2871 = vmatprep.subr.bf16.mxu0 (!%p3912_p10), %v4542_v61  ;;  %3083 = vmatprep.subr.bf16.mxu1 (!%p3912_p10), %v4544_v62  ;;  %v4552_v3 = vld [vmem:[#allocation9 + $0xe0] ss:$16 sps:$4 sm:$0xff] (!%p3912_p10)  }
 0x215   : > { %v1099_v20 = vadd.f32 %v1017_v11, %v455_v15  ;;  %v1019_v21 = vpop.f32.mrb[13].mxu0  ;;  %v1101_v24 = vadd.f32 %v1070_v9, %v457_v16  ;;  %v1072_v26 = vpop.f32.mrb[13].mxu1  ;;  %v4553_v4 = vld [vmem:[#allocation9 + $0xe8] ss:$16 sps:$4 sm:$0xff] (!%p3912_p10)   ;;  %v4554_v5 = vld [vmem:[#allocation9 + $0x104] ss:$16 sps:$4 sm:$0xff] (!%p3912_p10)  }
 0x216   : > { %v1100_v25 = vadd.f32 %v1019_v21, %v456_v17  ;;  %v1021_v27 = vpop.f32.mrb[14].mxu0  ;;  %v1102_v29 = vadd.f32 %v1072_v26, %v458_v18  ;;  %v1074_v31 = vpop.f32.mrb[14].mxu1  ;;  %v4556_v6 = vld [vmem:[#allocation9 + $0x10c] ss:$16 sps:$4 sm:$0xff] (!%p3912_p10)   ;;  %v4558_v7 = vld [vmem:[#allocation9 + $0x100] ss:$16 sps:$4 sm:$0xff] (!%p3912_p10)  }
 0x217   : > { %1131 = vst [vmem:[#allocation2 + $0xa0] sm:$0xff] %v1099_v20  ;;  %v1107_v30 = vadd.f32 %v1021_v27, %v463_v19  ;;  %v1023_v32 = vpop.f32.mrb[15].mxu0  ;;  %1133 = vst [vmem:[#allocation2 + $0xb0] sm:$0xff] %v1101_v24  ;;  %v1109_v33 = vadd.f32 %v1074_v31, %v465_v22  ;;  %v1076_v35 = vpop.f32.mrb[15].mxu1  ;;  %2872 = vmatpush1.bf16.msra.mxu0 (!%p3912_p10), %v4546_v63  ;;  %3084 = vmatpush1.bf16.msra.mxu1 (!%p3912_p10), %v4547_v0  ;;  %v4559_v8 = vld [vmem:[#allocation9 + $0x108] ss:$16 sps:$4 sm:$0xff] (!%p3912_p10)  }
 0x218   : > { %1132 = vst [vmem:[#allocation2 + $0xa8] sm:$0xff] %v1100_v25  ;;  %v1108_v34 = vadd.f32 %v1023_v32, %v464_v23  ;;  %1134 = vst [vmem:[#allocation2 + $0xb8] sm:$0xff] %v1102_v29  ;;  %v1110_v36 = vadd.f32 %v1076_v35, %v466_v28  ;;  %2873 = vmatprep.subr.bf16.mxu0 (!%p3912_p10), %v4548_v1  ;;  %3085 = vmatprep.subr.bf16.mxu1 (!%p3912_p10), %v4550_v2  ;;  %v4560_v10 = vld [vmem:[#allocation9 + $0x124] ss:$16 sps:$4 sm:$0xff] (!%p3912_p10)   ;;  %v4562_v13 = vld [vmem:[#allocation9 + $0x12c] ss:$16 sps:$4 sm:$0xff] (!%p3912_p10)  }
 0x219   : > { %1139 = vst [vmem:[#allocation2 + $0xe0] sm:$0xff] %v1107_v30  ;;  %1141 = vst [vmem:[#allocation2 + $0xf0] sm:$0xff] %v1109_v33  ;;  %v4564_v14 = vld [vmem:[#allocation9 + $0x120] ss:$16 sps:$4 sm:$0xff] (!%p3912_p10)   ;;  %v4565_v15 = vld [vmem:[#allocation9 + $0x128] ss:$16 sps:$4 sm:$0xff] (!%p3912_p10)  }
 0x21a   : > { %1140 = vst [vmem:[#allocation2 + $0xe8] sm:$0xff] %v1108_v34  ;;  %1142 = vst [vmem:[#allocation2 + $0xf8] sm:$0xff] %v1110_v36  ;;  %v4566_v16 = vld [vmem:[#allocation9 + $0x144] ss:$16 sps:$4 sm:$0xff] (!%p3912_p10)   ;;  %v5729_v17 = vshrl.u32 (!%p3912_p10), %v1181_v12, 7  ;;  %v5732_v25 = vld [vmem:[#allocation8] sm:$0xff] (!%p3912_p10) }
 0x21b   : > { %2874 = vmatpush1.bf16.msra.mxu0 %v4552_v3  ;;  %3086 = vmatpush1.bf16.msra.mxu1 %v4553_v4  ;;  %v4568_v11 = vld [vmem:[#allocation9 + $0x14c] ss:$16 sps:$4 sm:$0xff]   ;;  %v4570_v18 = vld [vmem:[#allocation9 + $0x140] ss:$16 sps:$4 sm:$0xff]   ;;  %v4571_v19 = vld [vmem:[#allocation9 + $0x148] ss:$16 sps:$4 sm:$0xff]  }
 0x21c   : > { %2875 = vmatprep.subr.bf16.mxu0 %v4554_v5  ;;  %3087 = vmatprep.subr.bf16.mxu1 %v4556_v6  ;;  %v4572_v20 = vld [vmem:[#allocation9 + $0x164] ss:$16 sps:$4 sm:$0xff]   ;;  %v1187_v9 = vsub.s32 1, %v5729_v17  ;;  %v4574_v21 = vld [vmem:[#allocation9 + $0x16c] ss:$16 sps:$4 sm:$0xff]   ;;  %v1183_v33 = vsub.s32 0, %v5729_v17 }
 0x21d   : > { %v4576_v22 = vld [vmem:[#allocation9 + $0x160] ss:$16 sps:$4 sm:$0xff]   ;;  %v4577_v26 = vld [vmem:[#allocation9 + $0x168] ss:$16 sps:$4 sm:$0xff]   ;;  %v4578_v27 = vld [vmem:[#allocation9 + $0x184] ss:$16 sps:$4 sm:$0xff]  }
 0x21e   : > { %v1148_v23 = vld [vmem:[#allocation2 + $0x8] sm:$0xff]  ;;  %v5737_v28 = vrot.slane %v5732_v25, %v1187_v9  ;;  %v4580_v29 = vld [vmem:[#allocation9 + $0x18c] ss:$16 sps:$4 sm:$0xff]   ;;  %v4583_v34 = vld [vmem:[#allocation9 + $0x188] ss:$16 sps:$4 sm:$0xff]   ;;  %v5745_v42 = vrot.slane %v5732_v25, %v1183_v33 }
 0x21f   : > { %2876 = vmatpush1.bf16.msra.mxu0 %v4558_v7  ;;  %3088 = vmatpush1.bf16.msra.mxu1 %v4559_v8  ;;  %v1156_v24 = vld [vmem:[#allocation2 + $0x48] sm:$0xff]  ;;  %v4601_v56 = vld [vmem:[#allocation9 + $0x1e8] ss:$16 sps:$4 sm:$0xff]   ;;  %v4607_v58 = vld [vmem:[#allocation9 + $0x20c] ss:$16 sps:$4 sm:$0xff]  }
 0x220   : > { %2877 = vmatprep.subr.bf16.mxu0 %v4560_v10  ;;  %3089 = vmatprep.subr.bf16.mxu1 %v4562_v13  ;;  %v1222_v30 = vadd.f32 %v5737_v28, %v1148_v23  ;;  %v1230_v31 = vadd.f32 %v5737_v28, %v1156_v24  ;;  %v4582_v32 = vld [vmem:[#allocation9 + $0x180] ss:$16 sps:$4 sm:$0xff]   ;;  %v1221_v47 = vadd.f32 %v5745_v42, %v1147_v43  ;;  %v4604_v57 = vld [vmem:[#allocation9 + $0x204] ss:$16 sps:$4 sm:$0xff]   ;;  %v4605_v61 = vld [vmem:[#allocation9 + $0x208] ss:$16 sps:$4 sm:$0xff]  }
 0x221   : > { %v1229_v48 = vadd.f32 %v5745_v42, %v1155_v44  ;;  %v4600_v55 = vld [vmem:[#allocation9 + $0x1e0] ss:$16 sps:$4 sm:$0xff]   ;;  %v4610_v62 = vld [vmem:[#allocation9 + $0x224] ss:$16 sps:$4 sm:$0xff]   ;;  %v4613_v63 = vld [vmem:[#allocation9 + $0x22c] ss:$16 sps:$4 sm:$0xff]  }
 0x222   : > { %v1254_v35 = vmax.f32 %v1222_v30, 0.0  ;;  %v1262_v36 = vmax.f32 %v1230_v31, 0.0  ;;  %v1253_v53 = vmax.f32 %v1221_v47, 0.0  ;;  %v4602_v60 = vld [vmem:[#allocation9 + $0x200] ss:$16 sps:$4 sm:$0xff]   ;;  %v1163_v31 = vld [vmem:[#allocation2 + $0x80] sm:$0xff] }
 0x223   : > { %2878 = vmatpush1.bf16.msra.mxu0 %v4564_v14  ;;  %3090 = vmatpush1.bf16.msra.mxu1 %v4565_v15  ;;  %v1261_v54 = vmax.f32 %v1229_v48, 0.0  ;;  %v4608_v0 = vld [vmem:[#allocation9 + $0x220] ss:$16 sps:$4 sm:$0xff]   ;;  %v4611_v1 = vld [vmem:[#allocation9 + $0x228] ss:$16 sps:$4 sm:$0xff]  }
 0x224   : > { %2879 = vmatprep.subr.bf16.mxu0 %v4566_v16  ;;  %3091 = vmatprep.subr.bf16.mxu1 %v4568_v11  ;;  %v1286_v40 = vpack.c.bf16 %v1262_v36, %v1254_v35  ;;  %v4616_v2 = vld [vmem:[#allocation9 + $0x244] ss:$16 sps:$4 sm:$0xff]   ;;  %v4619_v3 = vld [vmem:[#allocation9 + $0x24c] ss:$16 sps:$4 sm:$0xff]   ;;  %v4614_v4 = vld [vmem:[#allocation9 + $0x240] ss:$16 sps:$4 sm:$0xff]   ;;  %v1237_v35 = vadd.f32 %v5745_v42, %v1163_v31 }
 0x225   : > { %v1285_v59 = vpack.c.bf16 %v1261_v54, %v1253_v53  ;;  %v4617_v5 = vld [vmem:[#allocation9 + $0x248] ss:$16 sps:$4 sm:$0xff]   ;;  %v4622_v6 = vld [vmem:[#allocation9 + $0x264] ss:$16 sps:$4 sm:$0xff]   ;;  %v4625_v7 = vld [vmem:[#allocation9 + $0x26c] ss:$16 sps:$4 sm:$0xff]  }
 0x226   : > { %2891 = vmatprep.mubr.bf16.mxu0 %v1286_v40  ;;  %3103 = vmatprep.mubr.bf16.mxu1 %v1286_v40  ;;  %v4620_v8 = vld [vmem:[#allocation9 + $0x260] ss:$16 sps:$4 sm:$0xff]   ;;  %v4623_v10 = vld [vmem:[#allocation9 + $0x268] ss:$16 sps:$4 sm:$0xff]   ;;  %v4628_v12 = vld [vmem:[#allocation9 + $0x284] ss:$16 sps:$4 sm:$0xff]  }
 0x227   : > { %2880 = vmatpush1.bf16.msra.mxu0 %v4570_v18  ;;  %3092 = vmatpush1.bf16.msra.mxu1 %v4571_v19  ;;  %v4631_v13 = vld [vmem:[#allocation9 + $0x28c] ss:$16 sps:$4 sm:$0xff]   ;;  %v4626_v14 = vld [vmem:[#allocation9 + $0x280] ss:$16 sps:$4 sm:$0xff]   ;;  %v4629_v15 = vld [vmem:[#allocation9 + $0x288] ss:$16 sps:$4 sm:$0xff]  }
 0x228   : > { %2881 = vmatprep.subr.bf16.mxu0 %v4572_v20  ;;  %3093 = vmatprep.subr.bf16.mxu1 %v4574_v21  ;;  %v4634_v16 = vld [vmem:[#allocation9 + $0x2a4] ss:$16 sps:$4 sm:$0xff]   ;;  %v4637_v11 = vld [vmem:[#allocation9 + $0x2ac] ss:$16 sps:$4 sm:$0xff]   ;;  %v1195_v20 = vsub.s32 3, %v5729_v17 }
 0x229   : > { %v1164_v18 = vld [vmem:[#allocation2 + $0x88] sm:$0xff]  ;;  %v4649_v40 = vld [vmem:[#allocation9 + $0x2ec] ss:$16 sps:$4 sm:$0xff]   ;;  %v1150_v44 = vld [vmem:[#allocation2 + $0x18] sm:$0xff] }
 0x22a   : > { %v1172_v19 = vld [vmem:[#allocation2 + $0xc8] sm:$0xff]  ;;  %v1238_v23 = vadd.f32 %v5737_v28, %v1164_v18  ;;  %v4655_v53 = vld [vmem:[#allocation9 + $0x30c] ss:$16 sps:$4 sm:$0xff]   ;;  %v4695_v31 = vld [vmem:[#allocation9 + $0x3e8] ss:$16 sps:$4 sm:$0xff]  }
 0x22b   : > { %2882 = vmatpush1.bf16.msra.mxu0 %v4576_v22  ;;  %3094 = vmatpush1.bf16.msra.mxu1 %v4577_v26  ;;  %v4632_v21 = vld [vmem:[#allocation9 + $0x2a0] ss:$16 sps:$4 sm:$0xff]   ;;  %v4635_v22 = vld [vmem:[#allocation9 + $0x2a8] ss:$16 sps:$4 sm:$0xff]   ;;  %v1246_v24 = vadd.f32 %v5737_v28, %v1172_v19  ;;  %v4640_v26 = vld [vmem:[#allocation9 + $0x2c4] ss:$16 sps:$4 sm:$0xff]  }
 0x22c   : > { %2883 = vmatprep.subr.bf16.mxu0 %v4578_v27  ;;  %3095 = vmatprep.subr.bf16.mxu1 %v4580_v29  ;;  %v4643_v27 = vld [vmem:[#allocation9 + $0x2cc] ss:$16 sps:$4 sm:$0xff]   ;;  %v1270_v29 = vmax.f32 %v1238_v23, 0.0  ;;  %v4641_v28 = vld [vmem:[#allocation9 + $0x2c8] ss:$16 sps:$4 sm:$0xff]  }
 0x22d   : > { %v1278_v30 = vmax.f32 %v1246_v24, 0.0  ;;  %v4644_v48 = vld [vmem:[#allocation9 + $0x2e0] ss:$16 sps:$4 sm:$0xff]   ;;  %v1157_v19 = vld [vmem:[#allocation2 + $0x50] sm:$0xff] }
 0x22e   : > { %v4689_v23 = vld [vmem:[#allocation9 + $0x3c8] ss:$16 sps:$4 sm:$0xff]  }
 0x22f   : > { %2884 = vmatpush1.bf16.msra.mxu0 %v4582_v32  ;;  %3096 = vmatpush1.bf16.msra.mxu1 %v4583_v34  ;;  %v1171_v32 = vld [vmem:[#allocation2 + $0xc0] sm:$0xff]  ;;  %v4638_v34 = vld [vmem:[#allocation9 + $0x2c0] ss:$16 sps:$4 sm:$0xff]  }
 0x230   : > { %2885 = vmatprep.subr.bf16.mxu0 %v4584_v37  ;;  %3097 = vmatprep.subr.bf16.mxu1 %v4586_v38  ;;  %v1245_v36 = vadd.f32 %v5745_v42, %v1171_v32  ;;  %v5757_v37 = vrot.slane %v5732_v25, %v1195_v20  ;;  %v1294_v38 = vpack.c.bf16 %v1278_v30, %v1270_v29  ;;  %v4697_v29 = vld [vmem:[#allocation9 + $0x3ec] ss:$16 sps:$4 sm:$0xff]   ;;  %v4692_v30 = vld [vmem:[#allocation9 + $0x3e0] ss:$16 sps:$4 sm:$0xff]  }
 0x232   : > { %v1277_v43 = vmax.f32 %v1245_v36, 0.0  ;;  %v4703_v36 = vld [vmem:[#allocation9 + $0x40c] ss:$16 sps:$4 sm:$0xff]  }
 0x233   : > { %2886 = vmatpush1.bf16.msra.mxu0 %v4588_v39  ;;  %3098 = vmatpush1.bf16.msra.mxu1 %v4589_v41  ;;  %v4646_v39 = vld [vmem:[#allocation9 + $0x2e4] ss:$16 sps:$4 sm:$0xff]   ;;  %v1269_v41 = vmax.f32 %v1237_v35, 0.0 }
 0x234   : > { %2887 = vmatprep.subr.bf16.mxu0 %v4590_v45  ;;  %3099 = vmatprep.subr.bf16.mxu1 %v4592_v46  ;;  %v1158_v45 = vld [vmem:[#allocation2 + $0x58] sm:$0xff]  ;;  %v1224_v46 = vadd.f32 %v5757_v37, %v1150_v44 }
 0x235   : > { %v1293_v42 = vpack.c.bf16 %v1277_v43, %v1269_v41  ;;  %v1232_v47 = vadd.f32 %v5757_v37, %v1158_v45  ;;  %v4700_v35 = vld [vmem:[#allocation9 + $0x404] ss:$16 sps:$4 sm:$0xff]   ;;  %v1203_v43 = vsub.s32 5, %v5729_v17  ;;  %v4709_v45 = vld [vmem:[#allocation9 + $0x42c] ss:$16 sps:$4 sm:$0xff]  }
 0x236   : > { %v1174_v41 = vld [vmem:[#allocation2 + $0xd8] sm:$0xff] }
 0x237   : > { %2888 = vmatpush1.bf16.msra.mxu0 %v4594_v49  ;;  %3100 = vmatpush1.bf16.msra.mxu1 %v4595_v50  ;;  %v4647_v49 = vld [vmem:[#allocation9 + $0x2e8] ss:$16 sps:$4 sm:$0xff]   ;;  %v4652_v50 = vld [vmem:[#allocation9 + $0x304] ss:$16 sps:$4 sm:$0xff]  }
 0x238   : > { %2889 = vmatprep.subr.bf16.mxu0 %v4596_v51  ;;  %3101 = vmatprep.subr.bf16.mxu1 %v4598_v52  ;;  %v1256_v51 = vmax.f32 %v1224_v46, 0.0  ;;  %v1264_v52 = vmax.f32 %v1232_v47, 0.0  ;;  %v4706_v44 = vld [vmem:[#allocation9 + $0x424] ss:$16 sps:$4 sm:$0xff]   ;;  %v1248_v46 = vadd.f32 %v5757_v37, %v1174_v41  ;;  %v4704_v47 = vld [vmem:[#allocation9 + $0x420] ss:$16 sps:$4 sm:$0xff]  }
 0x239   : > { %v4763_v41 = vld [vmem:[#allocation9 + $0x54c] ss:$16 sps:$4 sm:$0xff]  }
 0x23a   : > { %v1288_v54 = vpack.c.bf16 %v1264_v52, %v1256_v51  ;;  %v1165_v51 = vld [vmem:[#allocation2 + $0x90] sm:$0xff] }
 0x23b   : > { %2890 = vmatpush1.bf16.msra.mxu0 %v4600_v55  ;;  %3102 = vmatpush1.bf16.msra.mxu1 %v4601_v56  ;;  %v4650_v55 = vld [vmem:[#allocation9 + $0x300] ss:$16 sps:$4 sm:$0xff]   ;;  %v4653_v56 = vld [vmem:[#allocation9 + $0x308] ss:$16 sps:$4 sm:$0xff]  }
 0x23c   : > { %2912 = vmatprep.subr.bf16.mxu0 %v4604_v57  ;;  %3124 = vmatprep.subr.bf16.mxu1 %v4607_v58  ;;  %v4658_v57 = vld [vmem:[#allocation9 + $0x324] ss:$16 sps:$4 sm:$0xff]   ;;  %v4661_v58 = vld [vmem:[#allocation9 + $0x32c] ss:$16 sps:$4 sm:$0xff]  }
 0x23d   : > { %v1173_v52 = vld [vmem:[#allocation2 + $0xd0] sm:$0xff] }
 0x23e   : > { %2892 = vmatmul.mubr.bf16.vlgmr.msra.gmra.mrb[0].mxu0 %v1285_v59  ;;  %3104 = vmatmul.mubr.bf16.vlgmr.msra.gmra.mrb[0].mxu1 %v1285_v59  ;;  %v4656_v59 = vld [vmem:[#allocation9 + $0x320] ss:$16 sps:$4 sm:$0xff]  }
 0x23f   : > { %2913 = vmatpush1.bf16.msra.mxu0 %v4602_v60  ;;  %3125 = vmatpush1.bf16.msra.mxu1 %v4605_v61  ;;  %v4659_v60 = vld [vmem:[#allocation9 + $0x328] ss:$16 sps:$4 sm:$0xff]   ;;  %v4664_v61 = vld [vmem:[#allocation9 + $0x344] ss:$16 sps:$4 sm:$0xff]  }
 0x240   : > { %2914 = vmatprep.subr.bf16.mxu0 %v4610_v62  ;;  %3126 = vmatprep.subr.bf16.mxu1 %v4613_v63  ;;  %v4667_v62 = vld [vmem:[#allocation9 + $0x34c] ss:$16 sps:$4 sm:$0xff]   ;;  %v4662_v63 = vld [vmem:[#allocation9 + $0x340] ss:$16 sps:$4 sm:$0xff]  }
 0x241   : > { %2901 = vmatprep.mubr.bf16.mxu0 %v1294_v38  ;;  %3113 = vmatprep.mubr.bf16.mxu1 %v1294_v38  ;;  %v4701_v38 = vld [vmem:[#allocation9 + $0x408] ss:$16 sps:$4 sm:$0xff]  }
 0x243   : > { %2915 = vmatpush1.bf16.msra.mxu0 %v4608_v0  ;;  %3127 = vmatpush1.bf16.msra.mxu1 %v4611_v1  ;;  %v4665_v0 = vld [vmem:[#allocation9 + $0x348] ss:$16 sps:$4 sm:$0xff]   ;;  %v4670_v1 = vld [vmem:[#allocation9 + $0x364] ss:$16 sps:$4 sm:$0xff]  }
 0x244   : > { %2916 = vmatprep.subr.bf16.mxu0 %v4616_v2  ;;  %3128 = vmatprep.subr.bf16.mxu1 %v4619_v3  ;;  %v4673_v2 = vld [vmem:[#allocation9 + $0x36c] ss:$16 sps:$4 sm:$0xff]   ;;  %v4668_v3 = vld [vmem:[#allocation9 + $0x360] ss:$16 sps:$4 sm:$0xff]  }
 0x246   : > { %2902 = vmatmul.mubr.bf16.gmra.mrb[4].mxu0 %v1293_v42  ;;  %3114 = vmatmul.mubr.bf16.gmra.mrb[4].mxu1 %v1293_v42 }
 0x247   : > { %2917 = vmatpush1.bf16.msra.mxu0 %v4614_v4  ;;  %3129 = vmatpush1.bf16.msra.mxu1 %v4617_v5  ;;  %v4671_v4 = vld [vmem:[#allocation9 + $0x368] ss:$16 sps:$4 sm:$0xff]   ;;  %v4676_v5 = vld [vmem:[#allocation9 + $0x384] ss:$16 sps:$4 sm:$0xff]  }
 0x248   : > { %2918 = vmatprep.subr.bf16.mxu0 %v4622_v6  ;;  %3130 = vmatprep.subr.bf16.mxu1 %v4625_v7  ;;  %v4679_v6 = vld [vmem:[#allocation9 + $0x38c] ss:$16 sps:$4 sm:$0xff]   ;;  %v4674_v7 = vld [vmem:[#allocation9 + $0x380] ss:$16 sps:$4 sm:$0xff]  }
 0x249   : > { %2944 = vmatprep.mubr.bf16.mxu0 %v1288_v54  ;;  %3156 = vmatprep.mubr.bf16.mxu1 %v1288_v54 }
 0x24b   : > { %2919 = vmatpush1.bf16.msra.mxu0 %v4620_v8  ;;  %3131 = vmatpush1.bf16.msra.mxu1 %v4623_v10  ;;  %v4677_v8 = vld [vmem:[#allocation9 + $0x388] ss:$16 sps:$4 sm:$0xff]   ;;  %v1191_v10 = vsub.s32 2, %v5729_v17 }
 0x24c   : > { %2920 = vmatprep.subr.bf16.mxu0 %v4628_v12  ;;  %3132 = vmatprep.subr.bf16.mxu1 %v4631_v13  ;;  %v4682_v12 = vld [vmem:[#allocation9 + $0x3a4] ss:$16 sps:$4 sm:$0xff]   ;;  %v4685_v13 = vld [vmem:[#allocation9 + $0x3ac] ss:$16 sps:$4 sm:$0xff]  }
 0x24d   : > { %v1192_v18 = vrot.slane %v5732_v25, %v1191_v10 }
 0x24f   : > { %2921 = vmatpush1.bf16.msra.mxu0 %v4626_v14  ;;  %3133 = vmatpush1.bf16.msra.mxu1 %v4629_v15  ;;  %v4680_v14 = vld [vmem:[#allocation9 + $0x3a0] ss:$16 sps:$4 sm:$0xff]   ;;  %v4683_v15 = vld [vmem:[#allocation9 + $0x3a8] ss:$16 sps:$4 sm:$0xff]   ;;  %v1239_v54 = vadd.f32 %v1192_v18, %v1165_v51 }
 0x250   : > { %2922 = vmatprep.subr.bf16.mxu0 %v4634_v16  ;;  %3134 = vmatprep.subr.bf16.mxu1 %v4637_v11  ;;  %v4688_v16 = vld [vmem:[#allocation9 + $0x3c4] ss:$16 sps:$4 sm:$0xff]   ;;  %v1149_v11 = vld [vmem:[#allocation2 + $0x10] sm:$0xff]  ;;  %v4770_v51 = vld [vmem:[#allocation9 + $0x580] ss:$16 sps:$4 sm:$0xff]  }
 0x251   : > { %v1223_v24 = vadd.f32 %v1192_v18, %v1149_v11  ;;  %v4733_v11 = vld [vmem:[#allocation9 + $0x4ac] ss:$16 sps:$4 sm:$0xff]  }
 0x253   : > { %2923 = vmatpush1.bf16.msra.mxu0 %v4632_v21  ;;  %3135 = vmatpush1.bf16.msra.mxu1 %v4635_v22  ;;  %v4691_v21 = vld [vmem:[#allocation9 + $0x3cc] ss:$16 sps:$4 sm:$0xff]   ;;  %v4686_v22 = vld [vmem:[#allocation9 + $0x3c0] ss:$16 sps:$4 sm:$0xff]   ;;  %v1255_v32 = vmax.f32 %v1223_v24, 0.0 }
 0x254   : > { %2924 = vmatprep.subr.bf16.mxu0 %v4640_v26  ;;  %3136 = vmatprep.subr.bf16.mxu1 %v4643_v27  ;;  %v1231_v26 = vadd.f32 %v1192_v18, %v1157_v19  ;;  %v4694_v27 = vld [vmem:[#allocation9 + $0x3e4] ss:$16 sps:$4 sm:$0xff]   ;;  %v4731_v19 = vld [vmem:[#allocation9 + $0x4a8] ss:$16 sps:$4 sm:$0xff]  }
 0x255   : > { %v4737_v24 = vld [vmem:[#allocation9 + $0x4c8] ss:$16 sps:$4 sm:$0xff]  }
 0x257   : > { %2925 = vmatpush1.bf16.msra.mxu0 %v4638_v34  ;;  %3137 = vmatpush1.bf16.msra.mxu1 %v4641_v28  ;;  %v1263_v34 = vmax.f32 %v1231_v26, 0.0  ;;  %v4698_v28 = vld [vmem:[#allocation9 + $0x400] ss:$16 sps:$4 sm:$0xff]   ;;  %v4742_v26 = vld [vmem:[#allocation9 + $0x4e4] ss:$16 sps:$4 sm:$0xff]  }
 0x258   : > { %2926 = vmatprep.subr.bf16.mxu0 %v4646_v39  ;;  %3138 = vmatprep.subr.bf16.mxu1 %v4649_v40  ;;  %v1166_v40 = vld [vmem:[#allocation2 + $0x98] sm:$0xff] }
 0x259   : > { %v1287_v39 = vpack.c.bf16 %v1263_v34, %v1255_v32  ;;  %v1240_v42 = vadd.f32 %v5757_v37, %v1166_v40  ;;  %v4751_v32 = vld [vmem:[#allocation9 + $0x50c] ss:$16 sps:$4 sm:$0xff]   ;;  %v4746_v34 = vld [vmem:[#allocation9 + $0x500] ss:$16 sps:$4 sm:$0xff]   ;;  %v4760_v40 = vld [vmem:[#allocation9 + $0x544] ss:$16 sps:$4 sm:$0xff]  }
 0x25b   : > { %2927 = vmatpush1.bf16.msra.mxu0 %v4644_v48  ;;  %3139 = vmatpush1.bf16.msra.mxu1 %v4647_v49  ;;  %v4707_v48 = vld [vmem:[#allocation9 + $0x428] ss:$16 sps:$4 sm:$0xff]   ;;  %v1272_v49 = vmax.f32 %v1240_v42, 0.0  ;;  %v4769_v42 = vld [vmem:[#allocation9 + $0x56c] ss:$16 sps:$4 sm:$0xff]  }
 0x25c   : > { %2928 = vmatprep.subr.bf16.mxu0 %v4652_v50  ;;  %3140 = vmatprep.subr.bf16.mxu1 %v4655_v53  ;;  %v1280_v50 = vmax.f32 %v1248_v46, 0.0  ;;  %v4712_v53 = vld [vmem:[#allocation9 + $0x444] ss:$16 sps:$4 sm:$0xff]   ;;  %v4764_v46 = vld [vmem:[#allocation9 + $0x560] ss:$16 sps:$4 sm:$0xff]  }
 0x25e   : > { %v1296_v37 = vpack.c.bf16 %v1280_v50, %v1272_v49  ;;  %v4775_v49 = vld [vmem:[#allocation9 + $0x58c] ss:$16 sps:$4 sm:$0xff]   ;;  %v1199_v50 = vsub.s32 4, %v5729_v17 }
 0x25f   : > { %2929 = vmatpush1.bf16.msra.mxu0 %v4650_v55  ;;  %3141 = vmatpush1.bf16.msra.mxu1 %v4653_v56  ;;  %v1247_v55 = vadd.f32 %v1192_v18, %v1173_v52  ;;  %v5769_v56 = vrot.slane %v5732_v25, %v1203_v43  ;;  %v4728_v18 = vld [vmem:[#allocation9 + $0x4a0] ss:$16 sps:$4 sm:$0xff]   ;;  %v4773_v52 = vld [vmem:[#allocation9 + $0x588] ss:$16 sps:$4 sm:$0xff]  }
 0x260   : > { %2930 = vmatprep.subr.bf16.mxu0 %v4658_v57  ;;  %3142 = vmatprep.subr.bf16.mxu1 %v4661_v58  ;;  %v4715_v57 = vld [vmem:[#allocation9 + $0x44c] ss:$16 sps:$4 sm:$0xff]   ;;  %v4710_v58 = vld [vmem:[#allocation9 + $0x440] ss:$16 sps:$4 sm:$0xff]  }
 0x261   : > { %v4758_v43 = vld [vmem:[#allocation9 + $0x540] ss:$16 sps:$4 sm:$0xff]  }
 0x263   : > { %2931 = vmatpush1.bf16.msra.mxu0 %v4656_v59  ;;  %3143 = vmatpush1.bf16.msra.mxu1 %v4659_v60  ;;  %v1271_v59 = vmax.f32 %v1239_v54, 0.0  ;;  %v1279_v60 = vmax.f32 %v1247_v55, 0.0  ;;  %v4781_v54 = vld [vmem:[#allocation9 + $0x5ac] ss:$16 sps:$4 sm:$0xff]  }
 0x264   : > { %2932 = vmatprep.subr.bf16.mxu0 %v4664_v61  ;;  %3144 = vmatprep.subr.bf16.mxu1 %v4667_v62  ;;  %v1152_v61 = vld [vmem:[#allocation2 + $0x28] sm:$0xff]  ;;  %v5774_v55 = vld [vmem:[#allocation8] sm:$0xff] }
 0x265   : > { %v1160_v62 = vld [vmem:[#allocation2 + $0x68] sm:$0xff] }
 0x266   : > { %v1234_v25 = vadd.f32 %v5769_v56, %v1160_v62  ;;  %v4787_v62 = vld [vmem:[#allocation9 + $0x5cc] ss:$16 sps:$4 sm:$0xff]  }
 0x267   : > { %2933 = vmatpush1.bf16.msra.mxu0 %v4662_v63  ;;  %3145 = vmatpush1.bf16.msra.mxu1 %v4665_v0  ;;  %v4713_v63 = vld [vmem:[#allocation9 + $0x448] ss:$16 sps:$4 sm:$0xff]   ;;  %v4718_v0 = vld [vmem:[#allocation9 + $0x464] ss:$16 sps:$4 sm:$0xff]  }
 0x268   : > { %2934 = vmatprep.subr.bf16.mxu0 %v4670_v1  ;;  %3146 = vmatprep.subr.bf16.mxu1 %v4673_v2  ;;  %v1295_v1 = vpack.c.bf16 %v1279_v60, %v1271_v59  ;;  %v1226_v2 = vadd.f32 %v5769_v56, %v1152_v61  ;;  %v4779_v59 = vld [vmem:[#allocation9 + $0x5a8] ss:$16 sps:$4 sm:$0xff]   ;;  %v4784_v61 = vld [vmem:[#allocation9 + $0x5c4] ss:$16 sps:$4 sm:$0xff]  }
 0x269   : > { %v1159_v60 = vld [vmem:[#allocation2 + $0x60] sm:$0xff] }
 0x26b   : > { %2935 = vmatpush1.bf16.msra.mxu0 %v4668_v3  ;;  %3147 = vmatpush1.bf16.msra.mxu1 %v4671_v4  ;;  %v4721_v3 = vld [vmem:[#allocation9 + $0x46c] ss:$16 sps:$4 sm:$0xff]   ;;  %v1258_v4 = vmax.f32 %v1226_v2, 0.0  ;;  %v1176_v2 = vld [vmem:[#allocation2 + $0xe8] sm:$0xff] }
 0x26c   : > { %2936 = vmatprep.subr.bf16.mxu0 %v4676_v5  ;;  %3148 = vmatprep.subr.bf16.mxu1 %v4679_v6  ;;  %v1266_v5 = vmax.f32 %v1234_v25, 0.0  ;;  %v4716_v6 = vld [vmem:[#allocation9 + $0x460] ss:$16 sps:$4 sm:$0xff]   ;;  %v1211_v25 = vsub.s32 7, %v5729_v17 }
 0x26f   : > { %2937 = vmatpush1.bf16.msra.mxu0 %v4674_v7  ;;  %3149 = vmatpush1.bf16.msra.mxu1 %v4677_v8  ;;  %v4719_v7 = vld [vmem:[#allocation9 + $0x468] ss:$16 sps:$4 sm:$0xff]   ;;  %v1290_v8 = vpack.c.bf16 %v1266_v5, %v1258_v4  ;;  %v4790_v5 = vld [vmem:[#allocation9 + $0x5e4] ss:$16 sps:$4 sm:$0xff]  }
 0x270   : > { %2938 = vmatprep.subr.bf16.mxu0 %v4682_v12  ;;  %3150 = vmatprep.subr.bf16.mxu1 %v4685_v13  ;;  %v4724_v12 = vld [vmem:[#allocation9 + $0x484] ss:$16 sps:$4 sm:$0xff]   ;;  %v4727_v13 = vld [vmem:[#allocation9 + $0x48c] ss:$16 sps:$4 sm:$0xff]   ;;  %v4785_v4 = vld [vmem:[#allocation9 + $0x5c8] ss:$16 sps:$4 sm:$0xff]  }
 0x273   : > { %2939 = vmatpush1.bf16.msra.mxu0 %v4680_v14  ;;  %3151 = vmatpush1.bf16.msra.mxu1 %v4683_v15  ;;  %v4722_v14 = vld [vmem:[#allocation9 + $0x480] ss:$16 sps:$4 sm:$0xff]   ;;  %v4725_v15 = vld [vmem:[#allocation9 + $0x488] ss:$16 sps:$4 sm:$0xff]  }
 0x274   : > { %2940 = vmatprep.subr.bf16.mxu0 %v4688_v16  ;;  %3152 = vmatprep.subr.bf16.mxu1 %v4691_v21  ;;  %v4730_v16 = vld [vmem:[#allocation9 + $0x4a4] ss:$16 sps:$4 sm:$0xff]  }
 0x275   : > { %v4736_v21 = vld [vmem:[#allocation9 + $0x4c4] ss:$16 sps:$4 sm:$0xff]  }
 0x277   : > { %2941 = vmatpush1.bf16.msra.mxu0 %v4686_v22  ;;  %3153 = vmatpush1.bf16.msra.mxu1 %v4689_v23  ;;  %v4739_v22 = vld [vmem:[#allocation9 + $0x4cc] ss:$16 sps:$4 sm:$0xff]   ;;  %v4734_v23 = vld [vmem:[#allocation9 + $0x4c0] ss:$16 sps:$4 sm:$0xff]  }
 0x278   : > { %2942 = vmatprep.subr.bf16.mxu0 %v4694_v27  ;;  %3154 = vmatprep.subr.bf16.mxu1 %v4697_v29  ;;  %v4745_v27 = vld [vmem:[#allocation9 + $0x4ec] ss:$16 sps:$4 sm:$0xff]   ;;  %v4740_v29 = vld [vmem:[#allocation9 + $0x4e0] ss:$16 sps:$4 sm:$0xff]  }
 0x27b   : > { %2943 = vmatpush1.bf16.msra.mxu0 %v4692_v30  ;;  %3155 = vmatpush1.bf16.msra.mxu1 %v4695_v31  ;;  %v4743_v30 = vld [vmem:[#allocation9 + $0x4e8] ss:$16 sps:$4 sm:$0xff]   ;;  %v4748_v31 = vld [vmem:[#allocation9 + $0x504] ss:$16 sps:$4 sm:$0xff]  }
 0x27c   : > { %2965 = vmatprep.subr.bf16.mxu0 %v4700_v35  ;;  %3177 = vmatprep.subr.bf16.mxu1 %v4703_v36  ;;  %v4749_v35 = vld [vmem:[#allocation9 + $0x508] ss:$16 sps:$4 sm:$0xff]   ;;  %v4754_v36 = vld [vmem:[#allocation9 + $0x524] ss:$16 sps:$4 sm:$0xff]  }
 0x27e   : > { %2945 = vmatmul.mubr.bf16.vlgmr.msra.gmra.mrb[0].mxu0 %v1287_v39  ;;  %3157 = vmatmul.mubr.bf16.vlgmr.msra.gmra.mrb[0].mxu1 %v1287_v39  ;;  %v4755_v39 = vld [vmem:[#allocation9 + $0x528] ss:$16 sps:$4 sm:$0xff]  }
 0x27f   : > { %2966 = vmatpush1.bf16.msra.mxu0 %v4698_v28  ;;  %3178 = vmatpush1.bf16.msra.mxu1 %v4701_v38  ;;  %v4757_v28 = vld [vmem:[#allocation9 + $0x52c] ss:$16 sps:$4 sm:$0xff]   ;;  %v4752_v38 = vld [vmem:[#allocation9 + $0x520] ss:$16 sps:$4 sm:$0xff]  }
 0x280   : > { %2967 = vmatprep.subr.bf16.mxu0 %v4706_v44  ;;  %3179 = vmatprep.subr.bf16.mxu1 %v4709_v45  ;;  %v4761_v44 = vld [vmem:[#allocation9 + $0x548] ss:$16 sps:$4 sm:$0xff]   ;;  %v4766_v45 = vld [vmem:[#allocation9 + $0x564] ss:$16 sps:$4 sm:$0xff]  }
 0x281   : > { %2954 = vmatprep.mubr.bf16.mxu0 %v1296_v37  ;;  %3166 = vmatprep.mubr.bf16.mxu1 %v1296_v37  ;;  %v4776_v37 = vld [vmem:[#allocation9 + $0x5a0] ss:$16 sps:$4 sm:$0xff]  }
 0x283   : > { %2968 = vmatpush1.bf16.msra.mxu0 %v4704_v47  ;;  %3180 = vmatpush1.bf16.msra.mxu1 %v4707_v48  ;;  %v4767_v47 = vld [vmem:[#allocation9 + $0x568] ss:$16 sps:$4 sm:$0xff]   ;;  %v4772_v48 = vld [vmem:[#allocation9 + $0x584] ss:$16 sps:$4 sm:$0xff]  }
 0x284   : > { %2969 = vmatprep.subr.bf16.mxu0 %v4712_v53  ;;  %3181 = vmatprep.subr.bf16.mxu1 %v4715_v57  ;;  %v4778_v53 = vld [vmem:[#allocation9 + $0x5a4] ss:$16 sps:$4 sm:$0xff]   ;;  %v1200_v57 = vrot.slane %v5774_v55, %v1199_v50  ;;  %v4817_v50 = vld [vmem:[#allocation9 + $0x66c] ss:$16 sps:$4 sm:$0xff]  }
 0x286   : > { %2955 = vmatmul.mubr.bf16.gmra.mrb[4].mxu0 %v1295_v1  ;;  %3167 = vmatmul.mubr.bf16.gmra.mrb[4].mxu1 %v1295_v1  ;;  %v1233_v1 = vadd.f32 %v1200_v57, %v1159_v60  ;;  %v4829_v60 = vld [vmem:[#allocation9 + $0x6ac] ss:$16 sps:$4 sm:$0xff]  }
 0x287   : > { %2970 = vmatpush1.bf16.msra.mxu0 %v4710_v58  ;;  %3182 = vmatpush1.bf16.msra.mxu1 %v4713_v63  ;;  %v1151_v58 = vld [vmem:[#allocation2 + $0x20] sm:$0xff] }
 0x288   : > { %2971 = vmatprep.subr.bf16.mxu0 %v4718_v0  ;;  %3183 = vmatprep.subr.bf16.mxu1 %v4721_v3  ;;  %v1225_v63 = vadd.f32 %v1200_v57, %v1151_v58  ;;  %v1168_v0 = vld [vmem:[#allocation2 + $0xa8] sm:$0xff]  ;;  %v4821_v58 = vld [vmem:[#allocation9 + $0x688] ss:$16 sps:$4 sm:$0xff]  }
 0x289   : > { %2997 = vmatprep.mubr.bf16.mxu0 %v1290_v8  ;;  %3209 = vmatprep.mubr.bf16.mxu1 %v1290_v8  ;;  %v4782_v3 = vld [vmem:[#allocation9 + $0x5c0] ss:$16 sps:$4 sm:$0xff]  }
 0x28a   : > { %v4788_v8 = vld [vmem:[#allocation9 + $0x5e0] ss:$16 sps:$4 sm:$0xff]  }
 0x28b   : > { %2972 = vmatpush1.bf16.msra.mxu0 %v4716_v6  ;;  %3184 = vmatpush1.bf16.msra.mxu1 %v4719_v7  ;;  %v4793_v6 = vld [vmem:[#allocation9 + $0x5ec] ss:$16 sps:$4 sm:$0xff]   ;;  %v1242_v7 = vadd.f32 %v5769_v56, %v1168_v0 }
 0x28c   : > { %2973 = vmatprep.subr.bf16.mxu0 %v4724_v12  ;;  %3185 = vmatprep.subr.bf16.mxu1 %v4727_v13  ;;  %v4791_v12 = vld [vmem:[#allocation9 + $0x5e8] ss:$16 sps:$4 sm:$0xff]   ;;  %v1257_v13 = vmax.f32 %v1225_v63, 0.0  ;;  %v4832_v63 = vld [vmem:[#allocation9 + $0x6c4] ss:$16 sps:$4 sm:$0xff]  }
 0x28d   : > { %v4835_v0 = vld [vmem:[#allocation9 + $0x6cc] ss:$16 sps:$4 sm:$0xff]  }
 0x28f   : > { %2974 = vmatpush1.bf16.msra.mxu0 %v4722_v14  ;;  %3186 = vmatpush1.bf16.msra.mxu1 %v4725_v15  ;;  %v1250_v14 = vadd.f32 %v5769_v56, %v1176_v2  ;;  %v1167_v15 = vld [vmem:[#allocation2 + $0xa0] sm:$0xff] }
 0x290   : > { %2975 = vmatprep.subr.bf16.mxu0 %v4730_v16  ;;  %3187 = vmatprep.subr.bf16.mxu1 %v4733_v11  ;;  %v4796_v16 = vld [vmem:[#allocation9 + $0x604] ss:$16 sps:$4 sm:$0xff]   ;;  %v4799_v11 = vld [vmem:[#allocation9 + $0x60c] ss:$16 sps:$4 sm:$0xff]   ;;  %v4833_v2 = vld [vmem:[#allocation9 + $0x6c8] ss:$16 sps:$4 sm:$0xff]  }
 0x293   : > { %2976 = vmatpush1.bf16.msra.mxu0 %v4728_v18  ;;  %3188 = vmatpush1.bf16.msra.mxu1 %v4731_v19  ;;  %v1265_v18 = vmax.f32 %v1233_v1, 0.0  ;;  %v1175_v19 = vld [vmem:[#allocation2 + $0xe0] sm:$0xff]  ;;  %v4830_v1 = vld [vmem:[#allocation9 + $0x6c0] ss:$16 sps:$4 sm:$0xff]  }
 0x294   : > { %2977 = vmatprep.subr.bf16.mxu0 %v4736_v21  ;;  %3189 = vmatprep.subr.bf16.mxu1 %v4739_v22  ;;  %v1274_v21 = vmax.f32 %v1242_v7, 0.0  ;;  %v4794_v22 = vld [vmem:[#allocation9 + $0x600] ss:$16 sps:$4 sm:$0xff]   ;;  %v1249_v56 = vadd.f32 %v1200_v57, %v1175_v19  ;;  %v4847_v7 = vld [vmem:[#allocation9 + $0x70c] ss:$16 sps:$4 sm:$0xff]  }
 0x295   : > { %v4854_v19 = vld [vmem:[#allocation9 + $0x740] ss:$16 sps:$4 sm:$0xff]  }
 0x297   : > { %2978 = vmatpush1.bf16.msra.mxu0 %v4734_v23  ;;  %3190 = vmatpush1.bf16.msra.mxu1 %v4737_v24  ;;  %v4797_v23 = vld [vmem:[#allocation9 + $0x608] ss:$16 sps:$4 sm:$0xff]   ;;  %v1282_v24 = vmax.f32 %v1250_v14, 0.0  ;;  %v4853_v14 = vld [vmem:[#allocation9 + $0x72c] ss:$16 sps:$4 sm:$0xff]  }
 0x298   : > { %2979 = vmatprep.subr.bf16.mxu0 %v4742_v26  ;;  %3191 = vmatprep.subr.bf16.mxu1 %v4745_v27  ;;  %v1154_v26 = vld [vmem:[#allocation2 + $0x38] sm:$0xff]  ;;  %v5781_v27 = vrot.slane %v5774_v55, %v1211_v25 }
 0x299   : > { %v4838_v25 = vld [vmem:[#allocation9 + $0x6e4] ss:$16 sps:$4 sm:$0xff]  }
 0x29b   : > { %2980 = vmatpush1.bf16.msra.mxu0 %v4740_v29  ;;  %3192 = vmatpush1.bf16.msra.mxu1 %v4743_v30  ;;  %v1289_v29 = vpack.c.bf16 %v1265_v18, %v1257_v13  ;;  %v1241_v30 = vadd.f32 %v1200_v57, %v1167_v15  ;;  %v4823_v57 = vld [vmem:[#allocation9 + $0x68c] ss:$16 sps:$4 sm:$0xff]   ;;  %v4850_v13 = vld [vmem:[#allocation9 + $0x724] ss:$16 sps:$4 sm:$0xff]   ;;  %v4848_v15 = vld [vmem:[#allocation9 + $0x720] ss:$16 sps:$4 sm:$0xff]  }
 0x29c   : > { %2981 = vmatprep.subr.bf16.mxu0 %v4748_v31  ;;  %3193 = vmatprep.subr.bf16.mxu1 %v4751_v32  ;;  %v1162_v31 = vld [vmem:[#allocation2 + $0x78] sm:$0xff]  ;;  %v4859_v18 = vld [vmem:[#allocation9 + $0x74c] ss:$16 sps:$4 sm:$0xff]  }
 0x29d   : > { %v4802_v32 = vld [vmem:[#allocation9 + $0x624] ss:$16 sps:$4 sm:$0xff]  }
 0x29f   : > { %2982 = vmatpush1.bf16.msra.mxu0 %v4746_v34  ;;  %3194 = vmatpush1.bf16.msra.mxu1 %v4749_v35  ;;  %v4805_v34 = vld [vmem:[#allocation9 + $0x62c] ss:$16 sps:$4 sm:$0xff]   ;;  %v4800_v35 = vld [vmem:[#allocation9 + $0x620] ss:$16 sps:$4 sm:$0xff]  }
 0x2a0   : > { %2983 = vmatprep.subr.bf16.mxu0 %v4754_v36  ;;  %3195 = vmatprep.subr.bf16.mxu1 %v4757_v28  ;;  %v4803_v36 = vld [vmem:[#allocation9 + $0x628] ss:$16 sps:$4 sm:$0xff]   ;;  %v1298_v28 = vpack.c.bf16 %v1282_v24, %v1274_v21  ;;  %v4860_v24 = vld [vmem:[#allocation9 + $0x760] ss:$16 sps:$4 sm:$0xff]  }
 0x2a1   : > { %v4857_v21 = vld [vmem:[#allocation9 + $0x748] ss:$16 sps:$4 sm:$0xff]  }
 0x2a3   : > { %2984 = vmatpush1.bf16.msra.mxu0 %v4752_v38  ;;  %3196 = vmatpush1.bf16.msra.mxu1 %v4755_v39  ;;  %v1228_v38 = vadd.f32 %v5781_v27, %v1154_v26  ;;  %v1236_v39 = vadd.f32 %v5781_v27, %v1162_v31  ;;  %v4863_v26 = vld [vmem:[#allocation9 + $0x768] ss:$16 sps:$4 sm:$0xff]   ;;  %v4866_v31 = vld [vmem:[#allocation9 + $0x780] ss:$16 sps:$4 sm:$0xff]  }
 0x2a4   : > { %2985 = vmatprep.subr.bf16.mxu0 %v4760_v40  ;;  %3197 = vmatprep.subr.bf16.mxu1 %v4763_v41  ;;  %v1273_v40 = vmax.f32 %v1241_v30, 0.0  ;;  %v1281_v41 = vmax.f32 %v1249_v56, 0.0  ;;  %v4871_v30 = vld [vmem:[#allocation9 + $0x78c] ss:$16 sps:$4 sm:$0xff]   ;;  %v1207_v56 = vsub.s32 6, %v5729_v17 }
 0x2a7   : > { %2986 = vmatpush1.bf16.msra.mxu0 %v4758_v43  ;;  %3198 = vmatpush1.bf16.msra.mxu1 %v4761_v44  ;;  %v4808_v43 = vld [vmem:[#allocation9 + $0x644] ss:$16 sps:$4 sm:$0xff]   ;;  %v4811_v44 = vld [vmem:[#allocation9 + $0x64c] ss:$16 sps:$4 sm:$0xff]  }
 0x2a8   : > { %2987 = vmatprep.subr.bf16.mxu0 %v4766_v45  ;;  %3199 = vmatprep.subr.bf16.mxu1 %v4769_v42  ;;  %v4806_v45 = vld [vmem:[#allocation9 + $0x640] ss:$16 sps:$4 sm:$0xff]   ;;  %v1260_v42 = vmax.f32 %v1228_v38, 0.0  ;;  %v1208_v38 = vrot.slane %v5774_v55, %v1207_v56  ;;  %v4912_v56 = vld [vmem:[#allocation11 + $0x28] sm:$0xff]  }
 0x2ab   : > { %2988 = vmatpush1.bf16.msra.mxu0 %v4764_v46  ;;  %3200 = vmatpush1.bf16.msra.mxu1 %v4767_v47  ;;  %v1268_v46 = vmax.f32 %v1236_v39, 0.0  ;;  %v4809_v47 = vld [vmem:[#allocation9 + $0x648] ss:$16 sps:$4 sm:$0xff]   ;;  %v4880_v39 = vld [vmem:[#allocation9 + $0x7c4] ss:$16 sps:$4 sm:$0xff]  }
 0x2ac   : > { %2989 = vmatprep.subr.bf16.mxu0 %v4772_v48  ;;  %3201 = vmatprep.subr.bf16.mxu1 %v4775_v49  ;;  %v1297_v48 = vpack.c.bf16 %v1281_v41, %v1273_v40  ;;  %v4814_v49 = vld [vmem:[#allocation9 + $0x664] ss:$16 sps:$4 sm:$0xff]   ;;  %v1153_v40 = vld [vmem:[#allocation2 + $0x30] sm:$0xff] }
 0x2ad   : > { %v1161_v41 = vld [vmem:[#allocation2 + $0x70] sm:$0xff] }
 0x2af   : > { %2990 = vmatpush1.bf16.msra.mxu0 %v4770_v51  ;;  %3202 = vmatpush1.bf16.msra.mxu1 %v4773_v52  ;;  %v4812_v51 = vld [vmem:[#allocation9 + $0x660] ss:$16 sps:$4 sm:$0xff]   ;;  %v1292_v52 = vpack.c.bf16 %v1268_v46, %v1260_v42  ;;  %v1227_v42 = vadd.f32 %v1208_v38, %v1153_v40  ;;  %v1235_v46 = vadd.f32 %v1208_v38, %v1161_v41  ;;  %v4921_v40 = vld [vmem:[#allocation11 + $0xb8] sm:$0xff]  }
 0x2b0   : > { %2991 = vmatprep.subr.bf16.mxu0 %v4778_v53  ;;  %3203 = vmatprep.subr.bf16.mxu1 %v4781_v54  ;;  %v4815_v53 = vld [vmem:[#allocation9 + $0x668] ss:$16 sps:$4 sm:$0xff]   ;;  %v4820_v54 = vld [vmem:[#allocation9 + $0x684] ss:$16 sps:$4 sm:$0xff]  }
 0x2b1   : > { %v1557_v41 = vld [vmem:[%s5968_s24] sm:$0xf] }
 0x2b3   : > { %2992 = vmatpush1.bf16.msra.mxu0 %v4776_v37  ;;  %3204 = vmatpush1.bf16.msra.mxu1 %v4779_v59  ;;  %v4818_v37 = vld [vmem:[#allocation9 + $0x680] ss:$16 sps:$4 sm:$0xff]   ;;  %v4826_v59 = vld [vmem:[#allocation9 + $0x6a4] ss:$16 sps:$4 sm:$0xff]  }
 0x2b4   : > { %2993 = vmatprep.subr.bf16.mxu0 %v4784_v61  ;;  %3205 = vmatprep.subr.bf16.mxu1 %v4787_v62  ;;  %v4824_v61 = vld [vmem:[#allocation9 + $0x6a0] ss:$16 sps:$4 sm:$0xff]   ;;  %v4827_v62 = vld [vmem:[#allocation9 + $0x6a8] ss:$16 sps:$4 sm:$0xff]  }
 0x2b7   : > { %2994 = vmatpush1.bf16.msra.mxu0 %v4782_v3  ;;  %3206 = vmatpush1.bf16.msra.mxu1 %v4785_v4  ;;  %v4841_v3 = vld [vmem:[#allocation9 + $0x6ec] ss:$16 sps:$4 sm:$0xff]   ;;  %v4836_v4 = vld [vmem:[#allocation9 + $0x6e0] ss:$16 sps:$4 sm:$0xff]  }
 0x2b8   : > { %2995 = vmatprep.subr.bf16.mxu0 %v4790_v5  ;;  %3207 = vmatprep.subr.bf16.mxu1 %v4793_v6  ;;  %v4839_v5 = vld [vmem:[#allocation9 + $0x6e8] ss:$16 sps:$4 sm:$0xff]   ;;  %v4844_v6 = vld [vmem:[#allocation9 + $0x704] ss:$16 sps:$4 sm:$0xff]  }
 0x2bb   : > { %2996 = vmatpush1.bf16.msra.mxu0 %v4788_v8  ;;  %3208 = vmatpush1.bf16.msra.mxu1 %v4791_v12  ;;  %v4842_v8 = vld [vmem:[#allocation9 + $0x700] ss:$16 sps:$4 sm:$0xff]   ;;  %v4845_v12 = vld [vmem:[#allocation9 + $0x708] ss:$16 sps:$4 sm:$0xff]  }
 0x2bc   : > { %3018 = vmatprep.subr.bf16.mxu0 %v4796_v16  ;;  %3230 = vmatprep.subr.bf16.mxu1 %v4799_v11  ;;  %v4851_v16 = vld [vmem:[#allocation9 + $0x728] ss:$16 sps:$4 sm:$0xff]   ;;  %v4856_v11 = vld [vmem:[#allocation9 + $0x744] ss:$16 sps:$4 sm:$0xff]  }
 0x2be   : > { %2998 = vmatmul.mubr.bf16.vlgmr.msra.gmra.mrb[0].mxu0 %v1289_v29  ;;  %3210 = vmatmul.mubr.bf16.vlgmr.msra.gmra.mrb[0].mxu1 %v1289_v29  ;;  %v4868_v29 = vld [vmem:[#allocation9 + $0x784] ss:$16 sps:$4 sm:$0xff]  }
 0x2bf   : > { %3019 = vmatpush1.bf16.msra.mxu0 %v4794_v22  ;;  %3231 = vmatpush1.bf16.msra.mxu1 %v4797_v23  ;;  %v4862_v22 = vld [vmem:[#allocation9 + $0x764] ss:$16 sps:$4 sm:$0xff]   ;;  %v4865_v23 = vld [vmem:[#allocation9 + $0x76c] ss:$16 sps:$4 sm:$0xff]  }
 0x2c0   : > { %3020 = vmatprep.subr.bf16.mxu0 %v4802_v32  ;;  %3232 = vmatprep.subr.bf16.mxu1 %v4805_v34  ;;  %v4869_v32 = vld [vmem:[#allocation9 + $0x788] ss:$16 sps:$4 sm:$0xff]   ;;  %v4874_v34 = vld [vmem:[#allocation9 + $0x7a4] ss:$16 sps:$4 sm:$0xff]  }
 0x2c1   : > { %3007 = vmatprep.mubr.bf16.mxu0 %v1298_v28  ;;  %3219 = vmatprep.mubr.bf16.mxu1 %v1298_v28  ;;  %v4875_v28 = vld [vmem:[#allocation9 + $0x7a8] ss:$16 sps:$4 sm:$0xff]  }
 0x2c3   : > { %3021 = vmatpush1.bf16.msra.mxu0 %v4800_v35  ;;  %3233 = vmatpush1.bf16.msra.mxu1 %v4803_v36  ;;  %v4877_v35 = vld [vmem:[#allocation9 + $0x7ac] ss:$16 sps:$4 sm:$0xff]   ;;  %v4872_v36 = vld [vmem:[#allocation9 + $0x7a0] ss:$16 sps:$4 sm:$0xff]  }
 0x2c4   : > { %3022 = vmatprep.subr.bf16.mxu0 %v4808_v43  ;;  %3234 = vmatprep.subr.bf16.mxu1 %v4811_v44  ;;  %v4883_v43 = vld [vmem:[#allocation9 + $0x7cc] ss:$16 sps:$4 sm:$0xff]   ;;  %v1170_v44 = vld [vmem:[#allocation2 + $0xb8] sm:$0xff] }
 0x2c6   : > { %3008 = vmatmul.mubr.bf16.gmra.mrb[4].mxu0 %v1297_v48  ;;  %3220 = vmatmul.mubr.bf16.gmra.mrb[4].mxu1 %v1297_v48  ;;  %v4881_v48 = vld [vmem:[#allocation9 + $0x7c8] ss:$16 sps:$4 sm:$0xff]  }
 0x2c7   : > { %3023 = vmatpush1.bf16.msra.mxu0 %v4806_v45  ;;  %3235 = vmatpush1.bf16.msra.mxu1 %v4809_v47  ;;  %v1178_v45 = vld [vmem:[#allocation2 + $0xf8] sm:$0xff] }
 0x2c8   : > { %3024 = vmatprep.subr.bf16.mxu0 %v4814_v49  ;;  %3236 = vmatprep.subr.bf16.mxu1 %v4817_v50  ;;  %v4878_v47 = vld [vmem:[#allocation9 + $0x7c0] ss:$16 sps:$4 sm:$0xff]   ;;  %v1244_v49 = vadd.f32 %v5781_v27, %v1170_v44  ;;  %v1252_v55 = vadd.f32 %v5781_v27, %v1178_v45  ;;  %v4886_v50 = vld [vmem:[#allocation9 + $0x7e4] ss:$16 sps:$4 sm:$0xff]   ;;  %v1570_v44 = vrot.slane %v1557_v41, %v1191_v10 }
 0x2c9   : > { %3050 = vmatprep.mubr.bf16.mxu0 %v1292_v52  ;;  %3262 = vmatprep.mubr.bf16.mxu1 %v1292_v52  ;;  %v4884_v52 = vld [vmem:[#allocation9 + $0x7e0] ss:$16 sps:$4 sm:$0xff]   ;;  %v1566_v45 = vrot.slane %v1557_v41, %v1187_v9 }
 0x2cb   : > { %3025 = vmatpush1.bf16.msra.mxu0 %v4812_v51  ;;  %3237 = vmatpush1.bf16.msra.mxu1 %v4815_v53  ;;  %v4889_v51 = vld [vmem:[#allocation9 + $0x7ec] ss:$16 sps:$4 sm:$0xff]   ;;  %v1259_v53 = vmax.f32 %v1227_v42, 0.0  ;;  %v1574_v42 = vrot.slane %v1557_v41, %v1195_v20 }
 0x2cc   : > { %3026 = vmatprep.subr.bf16.mxu0 %v4820_v54  ;;  %3238 = vmatprep.subr.bf16.mxu1 %v4823_v57  ;;  %v1267_v54 = vmax.f32 %v1235_v46, 0.0  ;;  %v4887_v57 = vld [vmem:[#allocation9 + $0x7e8] ss:$16 sps:$4 sm:$0xff]  }
 0x2cf   : > { %3027 = vmatpush1.bf16.msra.mxu0 %v4818_v37  ;;  %3239 = vmatpush1.bf16.msra.mxu1 %v4821_v58  ;;  %v1276_v37 = vmax.f32 %v1244_v49, 0.0  ;;  %v1284_v58 = vmax.f32 %v1252_v55, 0.0 }
 0x2d0   : > { %3028 = vmatprep.subr.bf16.mxu0 %v4826_v59  ;;  %3240 = vmatprep.subr.bf16.mxu1 %v4829_v60  ;;  %v1169_v59 = vld [vmem:[#allocation2 + $0xb0] sm:$0xff] }
 0x2d1   : > { %v1177_v60 = vld [vmem:[#allocation2 + $0xf0] sm:$0xff]  ;;  %v1243_v27 = vadd.f32 %v1208_v38, %v1169_v59 }
 0x2d3   : > { %3029 = vmatpush1.bf16.msra.mxu0 %v4824_v61  ;;  %3241 = vmatpush1.bf16.msra.mxu1 %v4827_v62  ;;  %v4890_v61 = vld [vmem:[#allocation11 + $0x40] sm:$0xff]  }
 0x2d4   : > { %3030 = vmatprep.subr.bf16.mxu0 %v4832_v63  ;;  %3242 = vmatprep.subr.bf16.mxu1 %v4835_v0  ;;  %v4891_v62 = vld [vmem:[#allocation11 + $0xc0] sm:$0xff]   ;;  %v1291_v63 = vpack.c.bf16 %v1267_v54, %v1259_v53  ;;  %v1251_v0 = vadd.f32 %v1208_v38, %v1177_v60  ;;  %v4919_v38 = vld [vmem:[#allocation11 + $0xf8] sm:$0xff]  }
 0x2d7   : > { %3031 = vmatpush1.bf16.msra.mxu0 %v4830_v1  ;;  %3243 = vmatpush1.bf16.msra.mxu1 %v4833_v2  ;;  %v1300_v1 = vpack.c.bf16 %v1284_v58, %v1276_v37  ;;  %v4892_v2 = vld [vmem:[#allocation11] sm:$0xff]  }
 0x2d8   : > { %3032 = vmatprep.subr.bf16.mxu0 %v4838_v25  ;;  %3244 = vmatprep.subr.bf16.mxu1 %v4841_v3  ;;  %v4893_v25 = vld [vmem:[#allocation11 + $0x80] sm:$0xff]   ;;  %v4894_v3 = vld [vmem:[#allocation11 + $0x48] sm:$0xff]  }
 0x2db   : > { %3033 = vmatpush1.bf16.msra.mxu0 %v4836_v4  ;;  %3245 = vmatpush1.bf16.msra.mxu1 %v4839_v5  ;;  %v4895_v4 = vld [vmem:[#allocation11 + $0xc8] sm:$0xff]   ;;  %v1275_v5 = vmax.f32 %v1243_v27, 0.0 }
 0x2dc   : > { %3034 = vmatprep.subr.bf16.mxu0 %v4844_v6  ;;  %3246 = vmatprep.subr.bf16.mxu1 %v4847_v7  ;;  %v1283_v6 = vmax.f32 %v1251_v0, 0.0  ;;  %v4896_v7 = vld [vmem:[#allocation11 + $0x8] sm:$0xff]  }
 0x2df   : > { %3035 = vmatpush1.bf16.msra.mxu0 %v4842_v8  ;;  %3247 = vmatpush1.bf16.msra.mxu1 %v4845_v12  ;;  %v4897_v8 = vld [vmem:[#allocation11 + $0x88] sm:$0xff]   ;;  %v4898_v12 = vld [vmem:[#allocation11 + $0x50] sm:$0xff]  }
 0x2e0   : > { %3036 = vmatprep.subr.bf16.mxu0 %v4850_v13  ;;  %3248 = vmatprep.subr.bf16.mxu1 %v4853_v14  ;;  %v4899_v13 = vld [vmem:[#allocation11 + $0xd0] sm:$0xff]   ;;  %v1299_v14 = vpack.c.bf16 %v1283_v6, %v1275_v5 }
 0x2e3   : > { %3037 = vmatpush1.bf16.msra.mxu0 %v4848_v15  ;;  %3249 = vmatpush1.bf16.msra.mxu1 %v4851_v16  ;;  %v4900_v15 = vld [vmem:[#allocation11 + $0x10] sm:$0xff]  }
 0x2e4   : > { %3038 = vmatprep.subr.bf16.mxu0 %v4856_v11  ;;  %3250 = vmatprep.subr.bf16.mxu1 %v4859_v18  ;;  %v4901_v16 = vld [vmem:[#allocation11 + $0x90] sm:$0xff]   ;;  %v4902_v11 = vld [vmem:[#allocation11 + $0x58] sm:$0xff]  }
 0x2e5   : > { %v4903_v18 = vld [vmem:[#allocation11 + $0xd8] sm:$0xff]  }
 0x2e7   : > { %3039 = vmatpush1.bf16.msra.mxu0 %v4854_v19  ;;  %3251 = vmatpush1.bf16.msra.mxu1 %v4857_v21  ;;  %v4904_v19 = vld [vmem:[#allocation11 + $0x18] sm:$0xff]  }
 0x2e8   : > { %3040 = vmatprep.subr.bf16.mxu0 %v4862_v22  ;;  %3252 = vmatprep.subr.bf16.mxu1 %v4865_v23  ;;  %v4905_v21 = vld [vmem:[#allocation11 + $0x98] sm:$0xff]   ;;  %v4906_v22 = vld [vmem:[#allocation11 + $0x60] sm:$0xff]  }
 0x2e9   : > { %v4907_v23 = vld [vmem:[#allocation11 + $0xe0] sm:$0xff]  }
 0x2eb   : > { %3041 = vmatpush1.bf16.msra.mxu0 %v4860_v24  ;;  %3253 = vmatpush1.bf16.msra.mxu1 %v4863_v26  ;;  %v4908_v24 = vld [vmem:[#allocation11 + $0x20] sm:$0xff]  }
 0x2ec   : > { %3042 = vmatprep.subr.bf16.mxu0 %v4868_v29  ;;  %3254 = vmatprep.subr.bf16.mxu1 %v4871_v30  ;;  %v4909_v26 = vld [vmem:[#allocation11 + $0xa0] sm:$0xff]   ;;  %v4910_v29 = vld [vmem:[#allocation11 + $0x68] sm:$0xff]  }
 0x2ed   : > { %v4911_v30 = vld [vmem:[#allocation11 + $0xe8] sm:$0xff]  }
 0x2ef   : > { %3043 = vmatpush1.bf16.msra.mxu0 %v4866_v31  ;;  %3255 = vmatpush1.bf16.msra.mxu1 %v4869_v32  ;;  %v4913_v31 = vld [vmem:[#allocation11 + $0xa8] sm:$0xff]   ;;  %v4914_v32 = vld [vmem:[#allocation11 + $0x70] sm:$0xff]  }
 0x2f0   : > { %3044 = vmatprep.subr.bf16.mxu0 %v4874_v34  ;;  %3256 = vmatprep.subr.bf16.mxu1 %v4877_v35  ;;  %v4915_v34 = vld [vmem:[#allocation11 + $0xf0] sm:$0xff]  }
 0x2f1   : > { %v4916_v35 = vld [vmem:[#allocation11 + $0x30] sm:$0xff]  }
 0x2f3   : > { %3045 = vmatpush1.bf16.msra.mxu0 %v4872_v36  ;;  %3257 = vmatpush1.bf16.msra.mxu1 %v4875_v28  ;;  %v4917_v36 = vld [vmem:[#allocation11 + $0xb0] sm:$0xff]   ;;  %v4918_v28 = vld [vmem:[#allocation11 + $0x78] sm:$0xff]  }
 0x2f4   : > { %3046 = vmatprep.subr.bf16.mxu0 %v4880_v39  ;;  %3258 = vmatprep.subr.bf16.mxu1 %v4883_v43  ;;  %v4920_v39 = vld [vmem:[#allocation11 + $0x38] sm:$0xff]   ;;  %v1562_v43 = vrot.slane %v1557_v41, %v1183_v33 }
 0x2f7   : > { %3047 = vmatpush1.bf16.msra.mxu0 %v4878_v47  ;;  %3259 = vmatpush1.bf16.msra.mxu1 %v4881_v48 }
 0x2f8   : > { %3048 = vmatprep.subr.bf16.mxu0 %v4886_v50  ;;  %3260 = vmatprep.subr.bf16.mxu1 %v4889_v51 }
 0x2fb   : > { %3049 = vmatpush1.bf16.msra.mxu0 %v4884_v52  ;;  %3261 = vmatpush1.bf16.msra.mxu1 %v4887_v57 }
 0x2fc   : > { %4210 = vmatprep.subr.bf16.mxu0 %v4890_v61  ;;  %4238 = vmatprep.subr.bf16.mxu1 %v4891_v62 }
 0x2fe   : > { %3051 = vmatmul.mubr.bf16.vlgmr.msra.gmra.mrb[0].mxu0 %v1291_v63  ;;  %3263 = vmatmul.mubr.bf16.vlgmr.msra.gmra.mrb[0].mxu1 %v1291_v63 }
 0x2ff   : > { %3060 = vmatprep.mubr.bf16.mxu0 %v1300_v1  ;;  %3272 = vmatprep.mubr.bf16.mxu1 %v1300_v1 }
 0x300   : > { %4211 = vmatpush3.bf16.msra.mxu0 %v4892_v2  ;;  %4239 = vmatpush3.bf16.msra.mxu1 %v4893_v25 }
 0x301   : > { %4212 = vmatprep.subr.bf16.mxu0 %v4894_v3  ;;  %4240 = vmatprep.subr.bf16.mxu1 %v4895_v4 }
 0x304   : > { %4213 = vmatpush3.bf16.msra.mxu0 %v4896_v7  ;;  %4241 = vmatpush3.bf16.msra.mxu1 %v4897_v8 }
 0x305   : > { %4214 = vmatprep.subr.bf16.mxu0 %v4898_v12  ;;  %4242 = vmatprep.subr.bf16.mxu1 %v4899_v13 }
 0x306   : > { %3061 = vmatmul.mubr.bf16.gmra.mrb[4].mxu0 %v1299_v14  ;;  %3273 = vmatmul.mubr.bf16.gmra.mrb[4].mxu1 %v1299_v14 }
 0x308   : > { %4215 = vmatpush3.bf16.msra.mxu0 %v4900_v15  ;;  %4243 = vmatpush3.bf16.msra.mxu1 %v4901_v16 }
 0x309   : > { %4216 = vmatprep.subr.bf16.mxu0 %v4902_v11  ;;  %4244 = vmatprep.subr.bf16.mxu1 %v4903_v18 }
 0x30c   : > { %4217 = vmatpush3.bf16.msra.mxu0 %v4904_v19  ;;  %4245 = vmatpush3.bf16.msra.mxu1 %v4905_v21 }
 0x30d   : > { %4218 = vmatprep.subr.bf16.mxu0 %v4906_v22  ;;  %4246 = vmatprep.subr.bf16.mxu1 %v4907_v23 }
 0x310   : > { %4219 = vmatpush3.bf16.msra.mxu0 %v4908_v24  ;;  %4247 = vmatpush3.bf16.msra.mxu1 %v4909_v26 }
 0x311   : > { %4220 = vmatprep.subr.bf16.mxu0 %v4910_v29  ;;  %4248 = vmatprep.subr.bf16.mxu1 %v4911_v30 }
 0x314   : > { %4221 = vmatpush3.bf16.msra.mxu0 %v4912_v56  ;;  %4249 = vmatpush3.bf16.msra.mxu1 %v4913_v31 }
 0x315   : > { %4222 = vmatprep.subr.bf16.mxu0 %v4914_v32  ;;  %4250 = vmatprep.subr.bf16.mxu1 %v4915_v34 }
 0x318   : > { %4223 = vmatpush3.bf16.msra.mxu0 %v4916_v35  ;;  %4251 = vmatpush3.bf16.msra.mxu1 %v4917_v36 }
 0x319   : > { %4224 = vmatprep.subr.bf16.mxu0 %v4918_v28  ;;  %4252 = vmatprep.subr.bf16.mxu1 %v4919_v38 }
 0x31c   : > { %4225 = vmatpush3.bf16.msra.mxu0 %v4920_v39  ;;  %4253 = vmatpush3.bf16.msra.mxu1 %v4921_v40  ;;  %v4169_v40 = vld [vmem:[%s5969_s5] ss:$0 sm:$0xff] }
 0x3d1   : > { %v3052_v46 = vpop.f32.mrb[0].mxu0  ;;  %v3264_v47 = vpop.f32.mrb[0].mxu1 }
 0x3d2   : > { %v4266_v48 = vadd.f32 %v3052_v46, %v1562_v43  ;;  %v4274_v49 = vadd.f32 %v3264_v47, %v1570_v44  ;;  %v3054_v55 = vpop.f32.mrb[1].mxu0  ;;  %v3266_v50 = vpop.f32.mrb[1].mxu1 }
 0x3d3   : > { %v4267_v51 = vadd.f32 %v3054_v55, %v1566_v45  ;;  %v4275_v52 = vadd.f32 %v3266_v50, %v1574_v42  ;;  %v3056_v53 = vpop.f32.mrb[2].mxu0  ;;  %v3268_v54 = vpop.f32.mrb[2].mxu1 }
 0x3d4   : > { %v4268_v33 = vadd.f32 %v3056_v53, %v1562_v43  ;;  %v4276_v57 = vadd.f32 %v3268_v54, %v1570_v44  ;;  %v3058_v37 = vpop.f32.mrb[3].mxu0  ;;  %v3270_v10 = vpop.f32.mrb[3].mxu1  ;;  %v3283_v9 = vmax.f32 %v4266_v48, 0.0  ;;  %v3285_v60 = vmax.f32 %v4274_v49, 0.0 }
 0x3d5   : > { %v4269_v58 = vadd.f32 %v3058_v37, %v1566_v45  ;;  %v4277_v59 = vadd.f32 %v3270_v10, %v1574_v42  ;;  %v3284_v61 = vmax.f32 %v4267_v51, 0.0  ;;  %v3286_v62 = vmax.f32 %v4275_v52, 0.0 }
 0x3d6   : > { %v3287_v17 = vmax.f32 %v4268_v33, 0.0  ;;  %v3289_v20 = vmax.f32 %v4276_v57, 0.0 }
 0x3d7   : > { %v3288_v63 = vmax.f32 %v4269_v58, 0.0  ;;  %v3290_v27 = vmax.f32 %v4277_v59, 0.0 }
 0x3d8   : > { %v3299_v0 = vpack.c.bf16 %v3287_v17, %v3283_v9  ;;  %v3301_v1 = vpack.c.bf16 %v3289_v20, %v3285_v60 }
 0x3d9   : > { %v3300_v2 = vpack.c.bf16 %v3288_v63, %v3284_v61  ;;  %v3302_v25 = vpack.c.bf16 %v3290_v27, %v3286_v62  ;;  %v3062_v3 = vpop.f32.mrb[4].mxu0  ;;  %v3274_v4 = vpop.f32.mrb[4].mxu1 }
 0x3da   : > { %v4270_v5 = vadd.f32 %v3062_v3, %v1562_v43  ;;  %v4278_v6 = vadd.f32 %v3274_v4, %v1570_v44  ;;  %v3064_v7 = vpop.f32.mrb[5].mxu0  ;;  %v3276_v8 = vpop.f32.mrb[5].mxu1 }
 0x3db   : > { %v4271_v12 = vadd.f32 %v3064_v7, %v1566_v45  ;;  %v4279_v13 = vadd.f32 %v3276_v8, %v1574_v42  ;;  %v3066_v14 = vpop.f32.mrb[6].mxu0  ;;  %v3278_v15 = vpop.f32.mrb[6].mxu1  ;;  %3602 = vmatprep.mubr.bf16.mxu0 %v3300_v2  ;;  %3651 = vmatprep.mubr.bf16.mxu1 %v3302_v25 }
 0x3dc   : > { %v4272_v16 = vadd.f32 %v3066_v14, %v1562_v43  ;;  %v4280_v11 = vadd.f32 %v3278_v15, %v1570_v44  ;;  %v3068_v18 = vpop.f32.mrb[7].mxu0  ;;  %v3280_v19 = vpop.f32.mrb[7].mxu1  ;;  %3603 = vmatmul.mubr.bf16.vlgmr.msra.gmra.mrb[8].mxu0 %v3299_v0  ;;  %3652 = vmatmul.mubr.bf16.vlgmr.msra.gmra.mrb[8].mxu1 %v3301_v1  ;;  %v3291_v23 = vmax.f32 %v4270_v5, 0.0  ;;  %v3293_v24 = vmax.f32 %v4278_v6, 0.0 }
 0x3dd   : > { %v4273_v21 = vadd.f32 %v3068_v18, %v1566_v45  ;;  %v4281_v22 = vadd.f32 %v3280_v19, %v1574_v42  ;;  %v3292_v30 = vmax.f32 %v4271_v12, 0.0  ;;  %v3294_v56 = vmax.f32 %v4279_v13, 0.0 }
 0x3de   : > { %v3295_v26 = vmax.f32 %v4272_v16, 0.0  ;;  %v3297_v29 = vmax.f32 %v4280_v11, 0.0 }
 0x3df   : > { %v3296_v31 = vmax.f32 %v4273_v21, 0.0  ;;  %v3298_v32 = vmax.f32 %v4281_v22, 0.0 }
 0x3e0   : > { %v3303_v34 = vpack.c.bf16 %v3295_v26, %v3291_v23  ;;  %v3305_v35 = vpack.c.bf16 %v3297_v29, %v3293_v24 }
 0x3e1   : > { %v3304_v36 = vpack.c.bf16 %v3296_v31, %v3292_v30  ;;  %v3306_v28 = vpack.c.bf16 %v3298_v32, %v3294_v56 }
 0x3e3   : > { %3610 = vmatprep.mubr.bf16.mxu0 %v3304_v36  ;;  %3659 = vmatprep.mubr.bf16.mxu1 %v3306_v28 }
 0x3e4   : > { %3611 = vmatmul.mubr.bf16.gmra.mrb[12].mxu0 %v3303_v34  ;;  %3660 = vmatmul.mubr.bf16.gmra.mrb[12].mxu1 %v3305_v35 }
 0x4af   : > { %v4226_v38 = vpop.f32.mrb[8].mxu0  ;;  %v4254_v39 = vpop.f32.mrb[8].mxu1 }
 0x4b0   : > { %v4227_v41 = vpop.f32.mrb[9].mxu0  ;;  %v4255_v43 = vpop.f32.mrb[9].mxu1 }
 0x4b1   : > { %v4228_v44 = vadd.f32 %v4227_v41, %v4226_v38  ;;  %v4256_v45 = vadd.f32 %v4255_v43, %v4254_v39  ;;  %v4229_v42 = vpop.f32.mrb[10].mxu0  ;;  %v4257_v46 = vpop.f32.mrb[10].mxu1 }
 0x4b2   : > { %v4230_v47 = vpop.f32.mrb[11].mxu0  ;;  %v4258_v48 = vpop.f32.mrb[11].mxu1 }
 0x4b3   : > { %v3605_v49 = vadd.f32 %v4228_v44, %v4169_v40  ;;  %v4231_v55 = vadd.f32 %v4230_v47, %v4229_v42  ;;  %v4259_v50 = vadd.f32 %v4258_v48, %v4257_v46 }
 0x4b5   : > { %v3654_v51 = vadd.f32 %v4256_v45, %v3605_v49  ;;  %v3608_v52 = vadd.f32 %v4231_v55, %v4169_v40 }
 0x4b7   : > { %3668 = vst [vmem:[%s5637_s27] sm:$0xff] %v3654_v51  ;;  %v3657_v53 = vadd.f32 %v4259_v50, %v3608_v52  ;;  %v4232_v54 = vpop.f32.mrb[12].mxu0  ;;  %v4260_v33 = vpop.f32.mrb[12].mxu1 }
 0x4b8   : > { %v4233_v57 = vpop.f32.mrb[13].mxu0  ;;  %v4261_v37 = vpop.f32.mrb[13].mxu1 }
 0x4b9   : > { %3669 = vst [vmem:[%s5637_s27 + $0x8] sm:$0xff] %v3657_v53  ;;  %v4234_v10 = vadd.f32 %v4233_v57, %v4232_v54  ;;  %v4262_v58 = vadd.f32 %v4261_v37, %v4260_v33  ;;  %v4235_v59 = vpop.f32.mrb[14].mxu0  ;;  %v4263_v9 = vpop.f32.mrb[14].mxu1 }
 0x4ba   : > { %v4236_v60 = vpop.f32.mrb[15].mxu0  ;;  %v4264_v17 = vpop.f32.mrb[15].mxu1 }
 0x4bb   : > { %v3613_v20 = vadd.f32 %v4234_v10, %v4169_v40  ;;  %v4237_v61 = vadd.f32 %v4236_v60, %v4235_v59  ;;  %v4265_v62 = vadd.f32 %v4264_v17, %v4263_v9 }
 0x4bd   : > { %v3662_v63 = vadd.f32 %v4262_v58, %v3613_v20  ;;  %v3616_v27 = vadd.f32 %v4237_v61, %v4169_v40 }
 0x4bf   : > { %3670 = vst [vmem:[%s5637_s27 + $0x10] sm:$0xff] %v3662_v63  ;;  %v3665_v0 = vadd.f32 %v4265_v62, %v3616_v27 }
 0x4c1   : > { %3671 = vst [vmem:[%s5637_s27 + $0x18] sm:$0xff] %v3665_v0 }
 0x4c2 PF: > { %s5970_s6 = sld [smem:[#allocation21_spill]]  ;;  %s5972_s22 = sld [smem:[#allocation24_spill]] }
 0x4c3   : > { %s5973_s7 = sld [smem:[#allocation32_spill]]  ;;  %s3686_s19 = sshll.u32 %s5637_s27, 4  ;;  %s5814_s19 = int_to_ptr.vmem [resolvable:$true] %s3686_s19 }
 0x4c4   : > { %s5818_s2 = scalar_lea.sflag [#allocation5], %s392_s20  ;;  %s5067_s25 = scalar_lea.vmem %s5814_s19, 512 }
 0x4c5   : > { %p5068_p0 = scmp.ne.s32.totalorder %s5814_s19, %s5067_s25  ;;  %s5241_s24 = smov [#allocation12]  }
 0x4c6   : > { %s5071_s23 = sshll.u32 %s5241_s24, 4  ;;  %s5072_s23 = int_to_ptr.vmem [resolvable:$false] %s5071_s23 }
 0x4c7   : > { %s5073_s21 = scalar_lea.vmem %s5072_s23, 1024  ;;  %p5074_p12 = scmp.lt.s32.totalorder %s5814_s19, %s5072_s23 }
 0x4c8   : > { %s4209_s16 = sshll.u32 %s5970_s6, 9  ;;  %p5974_p5 = scmp.ne.s32.totalorder %s5972_s22, 0 }
 0x4c9   : > { %s5811_s15 = scalar_lea.hbm %s5973_s7, %s4209_s16  ;;  %p5075_p3 = scmp.lt.s32.totalorder %s5073_s21, %s5067_s25 }
 0x4ca   : > { %p5069_p11 = pnand %p5068_p0, %p5974_p5 }
 0x4cb   : > { %p5076_p13 = por %p5075_p3, %p5074_p12 }
 0x4cc   : > { %p5070_p8 = pneg %p5069_p11 }
 0x4ce   : > { %p5077_p7 = pnand %p5076_p13, %p5070_p8 }
 0x4d0   : > { %5080 = shalt.err (!%p5077_p7)
}
 0x4d1   : > { %s5081_s20 = scalar_lea.hbm %s5811_s15, 512  ;;  %s5085_s6 = scalar_lea.hbm %s5973_s7, 1024 }
 0x4d2   : > { %p5082_p6 = scmp.ne.s32.totalorder %s5811_s15, %s5081_s20  ;;  %p5086_p2 = scmp.lt.u32.totalorder %s5811_s15, %s5973_s7 }
 0x4d3   : > { %p5087_p9 = scmp.lt.u32.totalorder %s5085_s6, %s5081_s20  ;;  %p5089_p0 = scmp.lt.u32.totalorder %s5081_s20, %s5811_s15 }
 0x4d4   : > { %p5083_p1 = pnand %p5082_p6, %p5974_p5 }
 0x4d5   : > { %p5088_p10 = por %p5087_p9, %p5086_p2 }
 0x4d6   : > { %p5084_p4 = pneg %p5083_p1 }
 0x4d7   : > { %p5090_p11 = por %p5089_p0, %p5088_p10 }
 0x4d9   : > { %p5091_p8 = pnand %p5090_p11, %p5084_p4 }
 0x4db   : > { %5094 = shalt.err (!%p5091_p8)
}
 0x4dc   : > { %s5242_s3 = smov 128   ;;  %s5243_s18 = smov 8  }
 0x4dd   : > { %4347 = dma.vmem_to_hbm [thread:$0]  (%p5974_p5), %s5814_s19, 512, %s5811_s15, %s5818_s2, %s5242_s3, %s5242_s3, %s5243_s18  }
 0x4de PF: > { %s5975_s25 = sld [smem:[#allocation18_spill]]  ;;  %s5976_s24 = sld [smem:[#allocation25_spill]] }
 0x4df   : > { %p4377_p12 = scmp.ge.s32.totalorder %s5225_s14, 2 }
 0x4e4   : > { %s3701_s23 = sand.u32 1, %s5975_s25   ;;  %p5977_p3 = scmp.ne.s32.totalorder %s5976_s24, 0 }
 0x4e5   : > { %s3702_s21 = scalar_lea.sflag [#allocation5], %s3701_s23 }
 0x4e6   : > { %p4367_p13 = pnand %p4377_p12, %p5977_p3 }
 0x4e8   : > { %5168 = dma.done.wait (!%p4367_p13), %s3702_s21, 512  }
 0x4e9   : > { %5170 = vsyncadd (!%p4367_p13), %s3702_s21, 4294966784  ;;  %s27_s14 = sadd.s32 1, %s5225_s14   ;;  %s5979_s24 = sld [smem:[#allocation19_spill]] }
 0x4ea   : > { %p5847_p7 = scmp.ge.s32.totalorder %s27_s14, 8   ;;  %s5980_s22 = sld [smem:[#allocation26_spill]] }
 0x4eb   : > { %s5981_s15 = smov %s5999_s11  ;;  %s5982_s25 = smov %s5181_s26 }
 0x4ec   : > { %s5983_s26 = smov %s5501_s30  ;;  %s5984_s27 = smov %s5189_s28 }
 0x4ed   : > { %s5985_s28 = smov %s5193_s29  ;;  %s5986_s29 = smov %s5559_s4 }
 0x4ee   : > { %s5987_s30 = smov %s5201_s8  ;;  %s5988_s8 = smov %s5205_s9 }
 0x4ef   : > { %s5989_s9 = smov %s5504_s10  ;;  %s5990_s10 = smov %s5217_s12 }
 0x4f0   : > { %s5991_s11 = smov %s5221_s13  ;;  %s5992_s12 = smov %s5980_s22 }
 0x4f1   : > { %s5993_s13 = smov %s5981_s15  ;;  %26 = sbr.rel (!%p5847_p7) target bundleno = 20 (0x14), region = 126 }
 0x4f8   :  { %3707 = vsyncpa [#allocation4], 1 }
 0x4f9   :  { %3709 = vsyncpa [#allocation4 + $0x1], 1 }
 0x4fa   :  { %3710 = vsyncpa [#allocation7], 1 }
 0x4fb   :  { %3712 = vsyncpa [#allocation7 + $0x1], 1 }
 0x4fc   :  { %3713 = vsyncpa [#allocation10], 1 }
 0x4fd   :  { %3714 = vsyncpa [#allocation5], 1 }
 0x4fe   :  { %3716 = vsyncpa [#allocation5 + $0x1], 1 }

</bundles_post_ra>
